<compile_context>
chip_gen: v5e
topology: v5e:2x2
jax: 0.10.0
libtpu: 0.0.40
codegen_flags: <defaults>
</compile_context>

<pallas_src>
import jax
import jax.numpy as jnp
from jax import lax
from jax.experimental import pallas as pl
from jax.experimental.pallas import tpu as pltpu


# ----------------------------------------------------------------------------
# XLA-side layout helpers (tiny relayout passes; see TODO above)
# ----------------------------------------------------------------------------
def _pad1_space_to_depth2(x_nhwc):
    """Zero-pad H,W by 1 and space-to-depth(2): (N,H,W,C) -> (N,(H+2)//2,(W+2)//2,4C)."""
    N, H, W, C = x_nhwc.shape
    assert H % 2 == 0 and W % 2 == 0, "even spatial dims expected (stride-2, pad-1 conv)"
    xp = jnp.pad(x_nhwc, ((0, 0), (1, 1), (1, 1), (0, 0)))
    P, Q = (H + 2) // 2, (W + 2) // 2
    s = xp.reshape(N, P, 2, Q, 2, C)
    return jnp.transpose(s, (0, 1, 3, 2, 4, 5)).reshape(N, P, Q, 4 * C)


def remap_conv3x3_s2_weights(w_oihw):
    """(Co, Ci, 3, 3) conv weight -> (16*Ci, Co) with the 4 stride-2 taps stacked on K.

    With s = space_to_depth2(pad1(x)) (channel order (a, b, ci)), the conv becomes
        out[ho, wo] = concat_{t=(dp,dq)} s[ho+dp, wo+dq, :]  @  W_stack
    where W_stack[((2dp+dq)*4 + (2a+b))*Ci + ci, co] = w[co, ci, 2dp+a, 2dq+b]
    (zero when the original tap index 2dp+a or 2dq+b is >= 3).
    """
    c_out, c_in, kh, kw = w_oihw.shape
    w = jnp.zeros((2, 2, 2, 2, c_in, c_out), jnp.float32)   # [dp, dq, a, b, ci, co]
    for dp in range(2):
        for dq in range(2):
            for a in range(2):
                for b in range(2):
                    i, j = 2 * dp + a, 2 * dq + b
                    if i < kh and j < kw:
                        w = w.at[dp, dq, a, b].set(
                            w_oihw[:, :, i, j].astype(jnp.float32).T)
    return w.reshape(16 * c_in, c_out)


# ----------------------------------------------------------------------------
# Kernel 1: 3x3 stride-2 conv + bias + ReLU.  One stacked-tap matmul per output
#           row, everything carried in registers (no VMEM accumulator scratch).
# ----------------------------------------------------------------------------
def _conv3x3_s2_relu_kernel(s_ref, w_ref, b_ref, o_ref):
    # s_ref: (1, P, Q, K)    bf16  space-to-depth(2) input, K = 4*Cin
    # w_ref: (4*K, Co)       bf16  4 taps stacked along the contraction axis
    # b_ref: (1, Co)         f32
    # o_ref: (1, Ho, Wo, Co) bf16  with Ho = P - 1, Wo = Q - 1
    _, Ho, Wo, Co = o_ref.shape
    w = w_ref[...]          # weights loaded once, live in vregs across the row loop
    b = b_ref[...]

    def row_body(ho, carry):
        # (Wo, 4K) patch for one output row: 4 sublane-sliced loads, lane concat.
        taps = []
        for dp in range(2):
            for dq in range(2):
                tap = s_ref[0, pl.ds(ho + dp, 1), pl.ds(dq, Wo), :]   # (1, Wo, K)
                taps.append(tap[0])                                   # (Wo, K)
        patch = jnp.concatenate(taps, axis=-1)                        # (Wo, 4K) bf16
        y = jnp.dot(patch, w, preferred_element_type=jnp.float32)     # (Wo, Co) f32
        y = jnp.maximum(y + b, 0.0)
        o_ref[0, pl.ds(ho, 1), :, :] = y.astype(o_ref.dtype)[None]
        return carry

    _ = lax.fori_loop(0, Ho, row_body, 0, unroll=True)


def conv3x3_s2_relu(s, w_stack, bias):
    """s: (N,P,Q,K) bf16; w_stack: (4K, Co) bf16; bias: (1, Co) f32 -> (N,P-1,Q-1,Co) bf16."""
    N, P, Q, K = s.shape
    Ho, Wo = P - 1, Q - 1
    Co = w_stack.shape[-1]
    assert w_stack.shape[0] == 4 * K
    return pl.pallas_call(
        _conv3x3_s2_relu_kernel,
        out_shape=jax.ShapeDtypeStruct((N, Ho, Wo, Co), jnp.bfloat16),
        grid=(N,),
        in_specs=[
            pl.BlockSpec((1, P, Q, K), lambda n: (n, 0, 0, 0)),
            pl.BlockSpec((4 * K, Co), lambda n: (0, 0)),
            pl.BlockSpec((1, Co), lambda n: (0, 0)),
        ],
        out_specs=pl.BlockSpec((1, Ho, Wo, Co), lambda n: (n, 0, 0, 0)),
        compiler_params=pltpu.CompilerParams(dimension_semantics=("parallel",)),
    )(s, w_stack, bias)


# ----------------------------------------------------------------------------
# Kernel 2: second 3x3 stride-2 conv + ReLU, fused with AdaptiveAvgPool2d((1,1))
#           and the 1x1 conv_proj (pool-before-project).  The conv2 activation
#           never leaves VMEM/registers.
# ----------------------------------------------------------------------------
def _conv3x3_s2_relu_pool_proj_kernel(s_ref, w_ref, b_ref, wp_ref, bp_ref, o_ref):
    # s_ref:  (1, P, Q, K)  bf16  space-to-depth(2) input of conv2, K = 4*C1
    # w_ref:  (4*K, C)      bf16  stacked conv2 taps
    # b_ref:  (1, C)        f32
    # wp_ref: (C, D)        bf16  conv_proj (1x1 conv) as a matrix
    # bp_ref: (1, D)        f32
    # o_ref:  (1, 1, D)     f32   pooled + projected output for this batch element
    _, P, Q, _ = s_ref.shape
    Ho, Wo = P - 1, Q - 1
    C = w_ref.shape[-1]
    w = w_ref[...]
    b = b_ref[...]

    def row_body(ho, pooled):
        taps = []
        for dp in range(2):
            for dq in range(2):
                taps.append(s_ref[0, pl.ds(ho + dp, 1), pl.ds(dq, Wo), :][0])
        patch = jnp.concatenate(taps, axis=-1)                        # (Wo, 4K) bf16
        y = jnp.dot(patch, w, preferred_element_type=jnp.float32)     # (Wo, C) f32
        y = jnp.maximum(y + b, 0.0)
        # running spatial sum kept in registers (fori_loop carry), no VMEM RMW
        return pooled + jnp.sum(y, axis=0, keepdims=True)             # (1, C) f32

    pooled = lax.fori_loop(0, Ho, row_body,
                           jnp.zeros((1, C), jnp.float32), unroll=True)
    mean = pooled * (1.0 / (Ho * Wo))                                 # AdaptiveAvgPool2d((1,1))
    # pool-before-project: mean_HW(x @ Wp + bp) == mean_HW(x) @ Wp + bp (1x1 conv is linear).
    proj = jnp.dot(mean.astype(wp_ref.dtype), wp_ref[...],            # bf16 x bf16 on the MXU
                   preferred_element_type=jnp.float32)                # (1, D) f32
    o_ref[0, :, :] = proj + bp_ref[...]


def conv3x3_s2_relu_pool_proj(s, w_stack, bias, w_proj, b_proj):
    """(N,P,Q,K) bf16 -> (N, D) f32: conv2 + ReLU + global avg pool + 1x1 projection."""
    N, P, Q, K = s.shape
    C = w_stack.shape[-1]
    D = w_proj.shape[-1]
    assert w_stack.shape[0] == 4 * K and w_proj.shape[0] == C
    out = pl.pallas_call(
        _conv3x3_s2_relu_pool_proj_kernel,
        out_shape=jax.ShapeDtypeStruct((N, 1, D), jnp.float32),
        grid=(N,),
        in_specs=[
            pl.BlockSpec((1, P, Q, K), lambda n: (n, 0, 0, 0)),
            pl.BlockSpec((4 * K, C), lambda n: (0, 0)),
            pl.BlockSpec((1, C), lambda n: (0, 0)),
            pl.BlockSpec((C, D), lambda n: (0, 0)),
            pl.BlockSpec((1, D), lambda n: (0, 0)),
        ],
        out_specs=pl.BlockSpec((1, 1, D), lambda n: (n, 0, 0)),
        compiler_params=pltpu.CompilerParams(dimension_semantics=("parallel",)),
    )(s, w_stack, bias, w_proj, b_proj)
    return out[:, 0, :]


# ----------------------------------------------------------------------------
# GestureBackbone forward
# ----------------------------------------------------------------------------
def gesture_backbone_forward(x_nchw, params):
    # NCHW (PyTorch) -> NHWC; bf16 activations feed the MXU, accumulation stays f32.
    x = jnp.transpose(x_nchw, (0, 2, 3, 1)).astype(jnp.bfloat16)

    w1 = remap_conv3x3_s2_weights(params["conv1_w"]).astype(jnp.bfloat16)   # (4*K1, C1)
    b1 = params["conv1_b"].astype(jnp.float32)[None, :]
    w2 = remap_conv3x3_s2_weights(params["conv2_w"]).astype(jnp.bfloat16)   # (4*K2, C2)
    b2 = params["conv2_b"].astype(jnp.float32)[None, :]
    wp = params["proj_w"][:, :, 0, 0].astype(jnp.bfloat16).T                # (C2, D)
    bp = params["proj_b"].astype(jnp.float32)[None, :]

    # backbone layer 1: 3x3 stride-2 conv + ReLU (real channel counts, no 128-lane padding).
    s1 = _pad1_space_to_depth2(x)                     # (N, H/2+1, W/2+1, 4*C0) bf16
    y1 = conv3x3_s2_relu(s1, w1, b1)                  # (N, H/2, W/2, C1) bf16

    # backbone layer 2 + conv_proj (1x1) + AdaptiveAvgPool2d((1,1)) + flatten(1), one kernel.
    s2 = _pad1_space_to_depth2(y1)                    # (N, H/4+1, W/4+1, 4*C1) bf16
    return conv3x3_s2_relu_pool_proj(s2, w2, b2, wp, bp)   # (N, D) f32


# ----------------------------------------------------------------------------
# Reference (pure JAX, f32, literal module order) and test driver
# ----------------------------------------------------------------------------
def reference_forward(x_nchw, params):
    x = jnp.transpose(x_nchw, (0, 2, 3, 1)).astype(jnp.float32)

    def conv_relu(x, w_oihw, b):
        y = jax.lax.conv_general_dilated(
            x, jnp.transpose(w_oihw, (2, 3, 1, 0)),
            window_strides=(2, 2), padding=((1, 1), (1, 1)),
            dimension_numbers=("NHWC", "HWIO", "NHWC"))
        return jnp.maximum(y + b, 0.0)

    x = conv_relu(x, params["conv1_w"], params["conv1_b"])           # backbone
    x = conv_relu(x, params["conv2_w"], params["conv2_b"])
    proj = jnp.einsum("nhwc,dc->nhwd", x,                            # conv_proj (1x1)
                      params["proj_w"][:, :, 0, 0]) + params["proj_b"]
    return jnp.mean(proj, axis=(1, 2))                               # avg pool + flatten


def init_params(key):
    k1, k2, k3 = jax.random.split(key, 3)
    C0, C1, C2, D = 4, 8, 16, 32
    return {
        "conv1_w": 0.1 * jax.random.normal(k1, (C1, C0, 3, 3), jnp.float32),
        "conv1_b": jnp.zeros((C1,), jnp.float32),
        "conv2_w": 0.1 * jax.random.normal(k2, (C2, C1, 3, 3), jnp.float32),
        "conv2_b": jnp.zeros((C2,), jnp.float32),
        "proj_w": 0.1 * jax.random.normal(k3, (D, C2, 1, 1), jnp.float32),
        "proj_b": jnp.zeros((D,), jnp.float32),
    }


if __name__ == "__main__":
    key = jax.random.PRNGKey(0)
    kx, kp = jax.random.split(key)
    x = jax.random.normal(kx, (2, 4, 16, 16), jnp.float32)   # NCHW like PyTorch
    params = init_params(kp)

    out = jax.jit(gesture_backbone_forward)(x, params)
    out = jax.block_until_ready(out)
    assert out.shape == (2, 32), out.shape

    ref = reference_forward(x, params)
    max_err = float(jnp.max(jnp.abs(out - ref)))
    assert max_err < 5e-2, f"mismatch vs reference: max abs err = {max_err}"

    print("KERNEL_OK")
</pallas_src>

<mosaic_0001>
module attributes {stable_mosaic.version = 11 : i64} {
  func.func @_conv3x3_s2_relu_kernel(%arg0: i32, %arg1: memref<1x9x9x16xbf16, #tpu.memory_space<vmem>>, %arg2: memref<64x8xbf16, #tpu.memory_space<vmem>>, %arg3: memref<1x8xf32, #tpu.memory_space<vmem>>, %arg4: memref<1x8x8x8xbf16, #tpu.memory_space<vmem>>) attributes {dimension_semantics = [#tpu.dimension_semantics<parallel>], iteration_bounds = array<i64: 2>, scalar_prefetch = 0 : i64, scratch_operands = 0 : i64, tpu.core_type = #tpu.core_type<tc>, window_params = [{transform_indices = @transform_0, window_bounds = array<i64: 1, 9, 9, 16>}, {pipeline_mode = #tpu.pipeline_mode<synchronous>, transform_indices = @transform_1, window_bounds = array<i64: 64, 8>}, {pipeline_mode = #tpu.pipeline_mode<synchronous>, transform_indices = @transform_2, window_bounds = array<i64: 1, 8>}, {transform_indices = @transform_3, window_bounds = array<i64: 1, 8, 8, 8>}]} {
    %c0 = arith.constant 0 : index
    %c0_0 = arith.constant 0 : index
    %0 = vector.load %arg2[%c0, %c0_0] : memref<64x8xbf16, #tpu.memory_space<vmem>>, vector<64x8xbf16>
    %c0_1 = arith.constant 0 : index
    %c0_2 = arith.constant 0 : index
    %1 = vector.load %arg3[%c0_1, %c0_2] : memref<1x8xf32, #tpu.memory_space<vmem>>, vector<1x8xf32>
    %c0_i32 = arith.constant 0 : i32
    %c0_i32_3 = arith.constant 0 : i32
    %2 = arith.addi %c0_i32, %c0_i32_3 : i32
    %c0_4 = arith.constant 0 : index
    %3 = arith.index_cast %2 : i32 to index
    %c0_5 = arith.constant 0 : index
    %c0_6 = arith.constant 0 : index
    %4 = vector.load %arg1[%c0_4, %3, %c0_5, %c0_6] : memref<1x9x9x16xbf16, #tpu.memory_space<vmem>>, vector<1x1x8x16xbf16>
    %5 = vector.shape_cast %4 : vector<1x1x8x16xbf16> to vector<1x8x16xbf16>
    %6 = vector.shape_cast %5 : vector<1x8x16xbf16> to vector<8x16xbf16>
    %c0_i32_7 = arith.constant 0 : i32
    %7 = arith.addi %c0_i32, %c0_i32_7 : i32
    %c0_8 = arith.constant 0 : index
    %8 = arith.index_cast %7 : i32 to index
    %c1 = arith.constant 1 : index
    %c0_9 = arith.constant 0 : index
    %9 = vector.load %arg1[%c0_8, %8, %c1, %c0_9] : memref<1x9x9x16xbf16, #tpu.memory_space<vmem>>, vector<1x1x8x16xbf16>
    %10 = vector.shape_cast %9 : vector<1x1x8x16xbf16> to vector<1x8x16xbf16>
    %11 = vector.shape_cast %10 : vector<1x8x16xbf16> to vector<8x16xbf16>
    %c1_i32 = arith.constant 1 : i32
    %12 = arith.addi %c0_i32, %c1_i32 : i32
    %c0_10 = arith.constant 0 : index
    %13 = arith.index_cast %12 : i32 to index
    %c0_11 = arith.constant 0 : index
    %c0_12 = arith.constant 0 : index
    %14 = vector.load %arg1[%c0_10, %13, %c0_11, %c0_12] : memref<1x9x9x16xbf16, #tpu.memory_space<vmem>>, vector<1x1x8x16xbf16>
    %15 = vector.shape_cast %14 : vector<1x1x8x16xbf16> to vector<1x8x16xbf16>
    %16 = vector.shape_cast %15 : vector<1x8x16xbf16> to vector<8x16xbf16>
    %c1_i32_13 = arith.constant 1 : i32
    %17 = arith.addi %c0_i32, %c1_i32_13 : i32
    %c0_14 = arith.constant 0 : index
    %18 = arith.index_cast %17 : i32 to index
    %c1_15 = arith.constant 1 : index
    %c0_16 = arith.constant 0 : index
    %19 = vector.load %arg1[%c0_14, %18, %c1_15, %c0_16] : memref<1x9x9x16xbf16, #tpu.memory_space<vmem>>, vector<1x1x8x16xbf16>
    %20 = vector.shape_cast %19 : vector<1x1x8x16xbf16> to vector<1x8x16xbf16>
    %21 = vector.shape_cast %20 : vector<1x8x16xbf16> to vector<8x16xbf16>
    %22 = tpu.concatenate %6, %11, %16, %21 in 1 : vector<8x16xbf16>, vector<8x16xbf16>, vector<8x16xbf16>, vector<8x16xbf16> -> vector<8x64xbf16>
    %cst = arith.constant dense<0.000000e+00> : vector<8x8xf32>
    %23 = tpu.matmul %22, %0, %cst {dimension_numbers = #tpu.dot_dimension_numbers<[1], [0], [0], [1], [0, 0, 1, 1], [], []>} : vector<8x64xbf16>, vector<64x8xbf16>, vector<8x8xf32> -> vector<8x8xf32>
    %24 = vector.broadcast %1 : vector<1x8xf32> to vector<8x8xf32>
    %25 = arith.addf %23, %24 : vector<8x8xf32>
    %cst_17 = arith.constant 0.000000e+00 : f32
    %26 = vector.broadcast %cst_17 : f32 to vector<8x8xf32>
    %27 = arith.maximumf %25, %26 : vector<8x8xf32>
    %28 = arith.truncf %27 : vector<8x8xf32> to vector<8x8xbf16>
    %29 = vector.shape_cast %28 : vector<8x8xbf16> to vector<1x8x8xbf16>
    %c0_18 = arith.constant 0 : index
    %30 = arith.index_cast %c0_i32 : i32 to index
    %c0_19 = arith.constant 0 : index
    %c0_20 = arith.constant 0 : index
    %31 = vector.load %arg4[%c0_18, %30, %c0_19, %c0_20] : memref<1x8x8x8xbf16, #tpu.memory_space<vmem>>, vector<1x1x8x8xbf16>
    %32 = vector.shape_cast %31 : vector<1x1x8x8xbf16> to vector<1x8x8xbf16>
    %33 = vector.shape_cast %29 : vector<1x8x8xbf16> to vector<1x1x8x8xbf16>
    tpu.vector_store %arg4[%c0_18, %30, %c0_19, %c0_20], %33 {strides = array<i32>} : memref<1x8x8x8xbf16, #tpu.memory_space<vmem>>, vector<1x1x8x8xbf16>,
    %c1_i32_21 = arith.constant 1 : i32
    %c0_i32_22 = arith.constant 0 : i32
    %34 = arith.addi %c1_i32_21, %c0_i32_22 : i32
    %c0_23 = arith.constant 0 : index
    %35 = arith.index_cast %34 : i32 to index
    %c0_24 = arith.constant 0 : index
    %c0_25 = arith.constant 0 : index
    %36 = vector.load %arg1[%c0_23, %35, %c0_24, %c0_25] : memref<1x9x9x16xbf16, #tpu.memory_space<vmem>>, vector<1x1x8x16xbf16>
    %37 = vector.shape_cast %36 : vector<1x1x8x16xbf16> to vector<1x8x16xbf16>
    %38 = vector.shape_cast %37 : vector<1x8x16xbf16> to vector<8x16xbf16>
    %c0_i32_26 = arith.constant 0 : i32
    %39 = arith.addi %c1_i32_21, %c0_i32_26 : i32
    %c0_27 = arith.constant 0 : index
    %40 = arith.index_cast %39 : i32 to index
    %c1_28 = arith.constant 1 : index
    %c0_29 = arith.constant 0 : index
    %41 = vector.load %arg1[%c0_27, %40, %c1_28, %c0_29] : memref<1x9x9x16xbf16, #tpu.memory_space<vmem>>, vector<1x1x8x16xbf16>
    %42 = vector.shape_cast %41 : vector<1x1x8x16xbf16> to vector<1x8x16xbf16>
    %43 = vector.shape_cast %42 : vector<1x8x16xbf16> to vector<8x16xbf16>
    %c1_i32_30 = arith.constant 1 : i32
    %44 = arith.addi %c1_i32_21, %c1_i32_30 : i32
    %c0_31 = arith.constant 0 : index
    %45 = arith.index_cast %44 : i32 to index
    %c0_32 = arith.constant 0 : index
    %c0_33 = arith.constant 0 : index
    %46 = vector.load %arg1[%c0_31, %45, %c0_32, %c0_33] : memref<1x9x9x16xbf16, #tpu.memory_space<vmem>>, vector<1x1x8x16xbf16>
    %47 = vector.shape_cast %46 : vector<1x1x8x16xbf16> to vector<1x8x16xbf16>
    %48 = vector.shape_cast %47 : vector<1x8x16xbf16> to vector<8x16xbf16>
    %c1_i32_34 = arith.constant 1 : i32
    %49 = arith.addi %c1_i32_21, %c1_i32_34 : i32
    %c0_35 = arith.constant 0 : index
    %50 = arith.index_cast %49 : i32 to index
    %c1_36 = arith.constant 1 : index
    %c0_37 = arith.constant 0 : index
    %51 = vector.load %arg1[%c0_35, %50, %c1_36, %c0_37] : memref<1x9x9x16xbf16, #tpu.memory_space<vmem>>, vector<1x1x8x16xbf16>
    %52 = vector.shape_cast %51 : vector<1x1x8x16xbf16> to vector<1x8x16xbf16>
    %53 = vector.shape_cast %52 : vector<1x8x16xbf16> to vector<8x16xbf16>
    %54 = tpu.concatenate %38, %43, %48, %53 in 1 : vector<8x16xbf16>, vector<8x16xbf16>, vector<8x16xbf16>, vector<8x16xbf16> -> vector<8x64xbf16>
    %cst_38 = arith.constant dense<0.000000e+00> : vector<8x8xf32>
    %55 = tpu.matmul %54, %0, %cst_38 {dimension_numbers = #tpu.dot_dimension_numbers<[1], [0], [0], [1], [0, 0, 1, 1], [], []>} : vector<8x64xbf16>, vector<64x8xbf16>, vector<8x8xf32> -> vector<8x8xf32>
    %56 = vector.broadcast %1 : vector<1x8xf32> to vector<8x8xf32>
    %57 = arith.addf %55, %56 : vector<8x8xf32>
    %cst_39 = arith.constant 0.000000e+00 : f32
    %58 = vector.broadcast %cst_39 : f32 to vector<8x8xf32>
    %59 = arith.maximumf %57, %58 : vector<8x8xf32>
    %60 = arith.truncf %59 : vector<8x8xf32> to vector<8x8xbf16>
    %61 = vector.shape_cast %60 : vector<8x8xbf16> to vector<1x8x8xbf16>
    %c0_40 = arith.constant 0 : index
    %62 = arith.index_cast %c1_i32_21 : i32 to index
    %c0_41 = arith.constant 0 : index
    %c0_42 = arith.constant 0 : index
    %63 = vector.load %arg4[%c0_40, %62, %c0_41, %c0_42] : memref<1x8x8x8xbf16, #tpu.memory_space<vmem>>, vector<1x1x8x8xbf16>
    %64 = vector.shape_cast %63 : vector<1x1x8x8xbf16> to vector<1x8x8xbf16>
    %65 = vector.shape_cast %61 : vector<1x8x8xbf16> to vector<1x1x8x8xbf16>
    tpu.vector_store %arg4[%c0_40, %62, %c0_41, %c0_42], %65 {strides = array<i32>} : memref<1x8x8x8xbf16, #tpu.memory_space<vmem>>, vector<1x1x8x8xbf16>,
    %c2_i32 = arith.constant 2 : i32
    %c0_i32_43 = arith.constant 0 : i32
    %66 = arith.addi %c2_i32, %c0_i32_43 : i32
    %c0_44 = arith.constant 0 : index
    %67 = arith.index_cast %66 : i32 to index
    %c0_45 = arith.constant 0 : index
    %c0_46 = arith.constant 0 : index
    %68 = vector.load %arg1[%c0_44, %67, %c0_45, %c0_46] : memref<1x9x9x16xbf16, #tpu.memory_space<vmem>>, vector<1x1x8x16xbf16>
    %69 = vector.shape_cast %68 : vector<1x1x8x16xbf16> to vector<1x8x16xbf16>
    %70 = vector.shape_cast %69 : vector<1x8x16xbf16> to vector<8x16xbf16>
    %c0_i32_47 = arith.constant 0 : i32
    %71 = arith.addi %c2_i32, %c0_i32_47 : i32
    %c0_48 = arith.constant 0 : index
    %72 = arith.index_cast %71 : i32 to index
    %c1_49 = arith.constant 1 : index
    %c0_50 = arith.constant 0 : index
    %73 = vector.load %arg1[%c0_48, %72, %c1_49, %c0_50] : memref<1x9x9x16xbf16, #tpu.memory_space<vmem>>, vector<1x1x8x16xbf16>
    %74 = vector.shape_cast %73 : vector<1x1x8x16xbf16> to vector<1x8x16xbf16>
    %75 = vector.shape_cast %74 : vector<1x8x16xbf16> to vector<8x16xbf16>
    %c1_i32_51 = arith.constant 1 : i32
    %76 = arith.addi %c2_i32, %c1_i32_51 : i32
    %c0_52 = arith.constant 0 : index
    %77 = arith.index_cast %76 : i32 to index
    %c0_53 = arith.constant 0 : index
    %c0_54 = arith.constant 0 : index
    %78 = vector.load %arg1[%c0_52, %77, %c0_53, %c0_54] : memref<1x9x9x16xbf16, #tpu.memory_space<vmem>>, vector<1x1x8x16xbf16>
    %79 = vector.shape_cast %78 : vector<1x1x8x16xbf16> to vector<1x8x16xbf16>
    %80 = vector.shape_cast %79 : vector<1x8x16xbf16> to vector<8x16xbf16>
    %c1_i32_55 = arith.constant 1 : i32
    %81 = arith.addi %c2_i32, %c1_i32_55 : i32
    %c0_56 = arith.constant 0 : index
    %82 = arith.index_cast %81 : i32 to index
    %c1_57 = arith.constant 1 : index
    %c0_58 = arith.constant 0 : index
    %83 = vector.load %arg1[%c0_56, %82, %c1_57, %c0_58] : memref<1x9x9x16xbf16, #tpu.memory_space<vmem>>, vector<1x1x8x16xbf16>
    %84 = vector.shape_cast %83 : vector<1x1x8x16xbf16> to vector<1x8x16xbf16>
    %85 = vector.shape_cast %84 : vector<1x8x16xbf16> to vector<8x16xbf16>
    %86 = tpu.concatenate %70, %75, %80, %85 in 1 : vector<8x16xbf16>, vector<8x16xbf16>, vector<8x16xbf16>, vector<8x16xbf16> -> vector<8x64xbf16>
    %cst_59 = arith.constant dense<0.000000e+00> : vector<8x8xf32>
    %87 = tpu.matmul %86, %0, %cst_59 {dimension_numbers = #tpu.dot_dimension_numbers<[1], [0], [0], [1], [0, 0, 1, 1], [], []>} : vector<8x64xbf16>, vector<64x8xbf16>, vector<8x8xf32> -> vector<8x8xf32>
    %88 = vector.broadcast %1 : vector<1x8xf32> to vector<8x8xf32>
    %89 = arith.addf %87, %88 : vector<8x8xf32>
    %cst_60 = arith.constant 0.000000e+00 : f32
    %90 = vector.broadcast %cst_60 : f32 to vector<8x8xf32>
    %91 = arith.maximumf %89, %90 : vector<8x8xf32>
    %92 = arith.truncf %91 : vector<8x8xf32> to vector<8x8xbf16>
    %93 = vector.shape_cast %92 : vector<8x8xbf16> to vector<1x8x8xbf16>
    %c0_61 = arith.constant 0 : index
    %94 = arith.index_cast %c2_i32 : i32 to index
    %c0_62 = arith.constant 0 : index
    %c0_63 = arith.constant 0 : index
    %95 = vector.load %arg4[%c0_61, %94, %c0_62, %c0_63] : memref<1x8x8x8xbf16, #tpu.memory_space<vmem>>, vector<1x1x8x8xbf16>
    %96 = vector.shape_cast %95 : vector<1x1x8x8xbf16> to vector<1x8x8xbf16>
    %97 = vector.shape_cast %93 : vector<1x8x8xbf16> to vector<1x1x8x8xbf16>
    tpu.vector_store %arg4[%c0_61, %94, %c0_62, %c0_63], %97 {strides = array<i32>} : memref<1x8x8x8xbf16, #tpu.memory_space<vmem>>, vector<1x1x8x8xbf16>,
    %c3_i32 = arith.constant 3 : i32
    %c0_i32_64 = arith.constant 0 : i32
    %98 = arith.addi %c3_i32, %c0_i32_64 : i32
    %c0_65 = arith.constant 0 : index
    %99 = arith.index_cast %98 : i32 to index
    %c0_66 = arith.constant 0 : index
    %c0_67 = arith.constant 0 : index
    %100 = vector.load %arg1[%c0_65, %99, %c0_66, %c0_67] : memref<1x9x9x16xbf16, #tpu.memory_space<vmem>>, vector<1x1x8x16xbf16>
    %101 = vector.shape_cast %100 : vector<1x1x8x16xbf16> to vector<1x8x16xbf16>
    %102 = vector.shape_cast %101 : vector<1x8x16xbf16> to vector<8x16xbf16>
    %c0_i32_68 = arith.constant 0 : i32
    %103 = arith.addi %c3_i32, %c0_i32_68 : i32
    %c0_69 = arith.constant 0 : index
    %104 = arith.index_cast %103 : i32 to index
    %c1_70 = arith.constant 1 : index
    %c0_71 = arith.constant 0 : index
    %105 = vector.load %arg1[%c0_69, %104, %c1_70, %c0_71] : memref<1x9x9x16xbf16, #tpu.memory_space<vmem>>, vector<1x1x8x16xbf16>
    %106 = vector.shape_cast %105 : vector<1x1x8x16xbf16> to vector<1x8x16xbf16>
    %107 = vector.shape_cast %106 : vector<1x8x16xbf16> to vector<8x16xbf16>
    %c1_i32_72 = arith.constant 1 : i32
    %108 = arith.addi %c3_i32, %c1_i32_72 : i32
    %c0_73 = arith.constant 0 : index
    %109 = arith.index_cast %108 : i32 to index
    %c0_74 = arith.constant 0 : index
    %c0_75 = arith.constant 0 : index
    %110 = vector.load %arg1[%c0_73, %109, %c0_74, %c0_75] : memref<1x9x9x16xbf16, #tpu.memory_space<vmem>>, vector<1x1x8x16xbf16>
    %111 = vector.shape_cast %110 : vector<1x1x8x16xbf16> to vector<1x8x16xbf16>
    %112 = vector.shape_cast %111 : vector<1x8x16xbf16> to vector<8x16xbf16>
    %c1_i32_76 = arith.constant 1 : i32
    %113 = arith.addi %c3_i32, %c1_i32_76 : i32
    %c0_77 = arith.constant 0 : index
    %114 = arith.index_cast %113 : i32 to index
    %c1_78 = arith.constant 1 : index
    %c0_79 = arith.constant 0 : index
    %115 = vector.load %arg1[%c0_77, %114, %c1_78, %c0_79] : memref<1x9x9x16xbf16, #tpu.memory_space<vmem>>, vector<1x1x8x16xbf16>
    %116 = vector.shape_cast %115 : vector<1x1x8x16xbf16> to vector<1x8x16xbf16>
    %117 = vector.shape_cast %116 : vector<1x8x16xbf16> to vector<8x16xbf16>
    %118 = tpu.concatenate %102, %107, %112, %117 in 1 : vector<8x16xbf16>, vector<8x16xbf16>, vector<8x16xbf16>, vector<8x16xbf16> -> vector<8x64xbf16>
    %cst_80 = arith.constant dense<0.000000e+00> : vector<8x8xf32>
    %119 = tpu.matmul %118, %0, %cst_80 {dimension_numbers = #tpu.dot_dimension_numbers<[1], [0], [0], [1], [0, 0, 1, 1], [], []>} : vector<8x64xbf16>, vector<64x8xbf16>, vector<8x8xf32> -> vector<8x8xf32>
    %120 = vector.broadcast %1 : vector<1x8xf32> to vector<8x8xf32>
    %121 = arith.addf %119, %120 : vector<8x8xf32>
    %cst_81 = arith.constant 0.000000e+00 : f32
    %122 = vector.broadcast %cst_81 : f32 to vector<8x8xf32>
    %123 = arith.maximumf %121, %122 : vector<8x8xf32>
    %124 = arith.truncf %123 : vector<8x8xf32> to vector<8x8xbf16>
    %125 = vector.shape_cast %124 : vector<8x8xbf16> to vector<1x8x8xbf16>
    %c0_82 = arith.constant 0 : index
    %126 = arith.index_cast %c3_i32 : i32 to index
    %c0_83 = arith.constant 0 : index
    %c0_84 = arith.constant 0 : index
    %127 = vector.load %arg4[%c0_82, %126, %c0_83, %c0_84] : memref<1x8x8x8xbf16, #tpu.memory_space<vmem>>, vector<1x1x8x8xbf16>
    %128 = vector.shape_cast %127 : vector<1x1x8x8xbf16> to vector<1x8x8xbf16>
    %129 = vector.shape_cast %125 : vector<1x8x8xbf16> to vector<1x1x8x8xbf16>
    tpu.vector_store %arg4[%c0_82, %126, %c0_83, %c0_84], %129 {strides = array<i32>} : memref<1x8x8x8xbf16, #tpu.memory_space<vmem>>, vector<1x1x8x8xbf16>,
    %c4_i32 = arith.constant 4 : i32
    %c0_i32_85 = arith.constant 0 : i32
    %130 = arith.addi %c4_i32, %c0_i32_85 : i32
    %c0_86 = arith.constant 0 : index
    %131 = arith.index_cast %130 : i32 to index
    %c0_87 = arith.constant 0 : index
    %c0_88 = arith.constant 0 : index
    %132 = vector.load %arg1[%c0_86, %131, %c0_87, %c0_88] : memref<1x9x9x16xbf16, #tpu.memory_space<vmem>>, vector<1x1x8x16xbf16>
    %133 = vector.shape_cast %132 : vector<1x1x8x16xbf16> to vector<1x8x16xbf16>
    %134 = vector.shape_cast %133 : vector<1x8x16xbf16> to vector<8x16xbf16>
    %c0_i32_89 = arith.constant 0 : i32
    %135 = arith.addi %c4_i32, %c0_i32_89 : i32
    %c0_90 = arith.constant 0 : index
    %136 = arith.index_cast %135 : i32 to index
    %c1_91 = arith.constant 1 : index
    %c0_92 = arith.constant 0 : index
    %137 = vector.load %arg1[%c0_90, %136, %c1_91, %c0_92] : memref<1x9x9x16xbf16, #tpu.memory_space<vmem>>, vector<1x1x8x16xbf16>
    %138 = vector.shape_cast %137 : vector<1x1x8x16xbf16> to vector<1x8x16xbf16>
    %139 = vector.shape_cast %138 : vector<1x8x16xbf16> to vector<8x16xbf16>
    %c1_i32_93 = arith.constant 1 : i32
    %140 = arith.addi %c4_i32, %c1_i32_93 : i32
    %c0_94 = arith.constant 0 : index
    %141 = arith.index_cast %140 : i32 to index
    %c0_95 = arith.constant 0 : index
    %c0_96 = arith.constant 0 : index
    %142 = vector.load %arg1[%c0_94, %141, %c0_95, %c0_96] : memref<1x9x9x16xbf16, #tpu.memory_space<vmem>>, vector<1x1x8x16xbf16>
    %143 = vector.shape_cast %142 : vector<1x1x8x16xbf16> to vector<1x8x16xbf16>
    %144 = vector.shape_cast %143 : vector<1x8x16xbf16> to vector<8x16xbf16>
    %c1_i32_97 = arith.constant 1 : i32
    %145 = arith.addi %c4_i32, %c1_i32_97 : i32
    %c0_98 = arith.constant 0 : index
    %146 = arith.index_cast %145 : i32 to index
    %c1_99 = arith.constant 1 : index
    %c0_100 = arith.constant 0 : index
    %147 = vector.load %arg1[%c0_98, %146, %c1_99, %c0_100] : memref<1x9x9x16xbf16, #tpu.memory_space<vmem>>, vector<1x1x8x16xbf16>
    %148 = vector.shape_cast %147 : vector<1x1x8x16xbf16> to vector<1x8x16xbf16>
    %149 = vector.shape_cast %148 : vector<1x8x16xbf16> to vector<8x16xbf16>
    %150 = tpu.concatenate %134, %139, %144, %149 in 1 : vector<8x16xbf16>, vector<8x16xbf16>, vector<8x16xbf16>, vector<8x16xbf16> -> vector<8x64xbf16>
    %cst_101 = arith.constant dense<0.000000e+00> : vector<8x8xf32>
    %151 = tpu.matmul %150, %0, %cst_101 {dimension_numbers = #tpu.dot_dimension_numbers<[1], [0], [0], [1], [0, 0, 1, 1], [], []>} : vector<8x64xbf16>, vector<64x8xbf16>, vector<8x8xf32> -> vector<8x8xf32>
    %152 = vector.broadcast %1 : vector<1x8xf32> to vector<8x8xf32>
    %153 = arith.addf %151, %152 : vector<8x8xf32>
    %cst_102 = arith.constant 0.000000e+00 : f32
    %154 = vector.broadcast %cst_102 : f32 to vector<8x8xf32>
    %155 = arith.maximumf %153, %154 : vector<8x8xf32>
    %156 = arith.truncf %155 : vector<8x8xf32> to vector<8x8xbf16>
    %157 = vector.shape_cast %156 : vector<8x8xbf16> to vector<1x8x8xbf16>
    %c0_103 = arith.constant 0 : index
    %158 = arith.index_cast %c4_i32 : i32 to index
    %c0_104 = arith.constant 0 : index
    %c0_105 = arith.constant 0 : index
    %159 = vector.load %arg4[%c0_103, %158, %c0_104, %c0_105] : memref<1x8x8x8xbf16, #tpu.memory_space<vmem>>, vector<1x1x8x8xbf16>
    %160 = vector.shape_cast %159 : vector<1x1x8x8xbf16> to vector<1x8x8xbf16>
    %161 = vector.shape_cast %157 : vector<1x8x8xbf16> to vector<1x1x8x8xbf16>
    tpu.vector_store %arg4[%c0_103, %158, %c0_104, %c0_105], %161 {strides = array<i32>} : memref<1x8x8x8xbf16, #tpu.memory_space<vmem>>, vector<1x1x8x8xbf16>,
    %c5_i32 = arith.constant 5 : i32
    %c0_i32_106 = arith.constant 0 : i32
    %162 = arith.addi %c5_i32, %c0_i32_106 : i32
    %c0_107 = arith.constant 0 : index
    %163 = arith.index_cast %162 : i32 to index
    %c0_108 = arith.constant 0 : index
    %c0_109 = arith.constant 0 : index
    %164 = vector.load %arg1[%c0_107, %163, %c0_108, %c0_109] : memref<1x9x9x16xbf16, #tpu.memory_space<vmem>>, vector<1x1x8x16xbf16>
    %165 = vector.shape_cast %164 : vector<1x1x8x16xbf16> to vector<1x8x16xbf16>
    %166 = vector.shape_cast %165 : vector<1x8x16xbf16> to vector<8x16xbf16>
    %c0_i32_110 = arith.constant 0 : i32
    %167 = arith.addi %c5_i32, %c0_i32_110 : i32
    %c0_111 = arith.constant 0 : index
    %168 = arith.index_cast %167 : i32 to index
    %c1_112 = arith.constant 1 : index
    %c0_113 = arith.constant 0 : index
    %169 = vector.load %arg1[%c0_111, %168, %c1_112, %c0_113] : memref<1x9x9x16xbf16, #tpu.memory_space<vmem>>, vector<1x1x8x16xbf16>
    %170 = vector.shape_cast %169 : vector<1x1x8x16xbf16> to vector<1x8x16xbf16>
    %171 = vector.shape_cast %170 : vector<1x8x16xbf16> to vector<8x16xbf16>
    %c1_i32_114 = arith.constant 1 : i32
    %172 = arith.addi %c5_i32, %c1_i32_114 : i32
    %c0_115 = arith.constant 0 : index
    %173 = arith.index_cast %172 : i32 to index
    %c0_116 = arith.constant 0 : index
    %c0_117 = arith.constant 0 : index
    %174 = vector.load %arg1[%c0_115, %173, %c0_116, %c0_117] : memref<1x9x9x16xbf16, #tpu.memory_space<vmem>>, vector<1x1x8x16xbf16>
    %175 = vector.shape_cast %174 : vector<1x1x8x16xbf16> to vector<1x8x16xbf16>
    %176 = vector.shape_cast %175 : vector<1x8x16xbf16> to vector<8x16xbf16>
    %c1_i32_118 = arith.constant 1 : i32
    %177 = arith.addi %c5_i32, %c1_i32_118 : i32
    %c0_119 = arith.constant 0 : index
    %178 = arith.index_cast %177 : i32 to index
    %c1_120 = arith.constant 1 : index
    %c0_121 = arith.constant 0 : index
    %179 = vector.load %arg1[%c0_119, %178, %c1_120, %c0_121] : memref<1x9x9x16xbf16, #tpu.memory_space<vmem>>, vector<1x1x8x16xbf16>
    %180 = vector.shape_cast %179 : vector<1x1x8x16xbf16> to vector<1x8x16xbf16>
    %181 = vector.shape_cast %180 : vector<1x8x16xbf16> to vector<8x16xbf16>
    %182 = tpu.concatenate %166, %171, %176, %181 in 1 : vector<8x16xbf16>, vector<8x16xbf16>, vector<8x16xbf16>, vector<8x16xbf16> -> vector<8x64xbf16>
    %cst_122 = arith.constant dense<0.000000e+00> : vector<8x8xf32>
    %183 = tpu.matmul %182, %0, %cst_122 {dimension_numbers = #tpu.dot_dimension_numbers<[1], [0], [0], [1], [0, 0, 1, 1], [], []>} : vector<8x64xbf16>, vector<64x8xbf16>, vector<8x8xf32> -> vector<8x8xf32>
    %184 = vector.broadcast %1 : vector<1x8xf32> to vector<8x8xf32>
    %185 = arith.addf %183, %184 : vector<8x8xf32>
    %cst_123 = arith.constant 0.000000e+00 : f32
    %186 = vector.broadcast %cst_123 : f32 to vector<8x8xf32>
    %187 = arith.maximumf %185, %186 : vector<8x8xf32>
    %188 = arith.truncf %187 : vector<8x8xf32> to vector<8x8xbf16>
    %189 = vector.shape_cast %188 : vector<8x8xbf16> to vector<1x8x8xbf16>
    %c0_124 = arith.constant 0 : index
    %190 = arith.index_cast %c5_i32 : i32 to index
    %c0_125 = arith.constant 0 : index
    %c0_126 = arith.constant 0 : index
    %191 = vector.load %arg4[%c0_124, %190, %c0_125, %c0_126] : memref<1x8x8x8xbf16, #tpu.memory_space<vmem>>, vector<1x1x8x8xbf16>
    %192 = vector.shape_cast %191 : vector<1x1x8x8xbf16> to vector<1x8x8xbf16>
    %193 = vector.shape_cast %189 : vector<1x8x8xbf16> to vector<1x1x8x8xbf16>
    tpu.vector_store %arg4[%c0_124, %190, %c0_125, %c0_126], %193 {strides = array<i32>} : memref<1x8x8x8xbf16, #tpu.memory_space<vmem>>, vector<1x1x8x8xbf16>,
    %c6_i32 = arith.constant 6 : i32
    %c0_i32_127 = arith.constant 0 : i32
    %194 = arith.addi %c6_i32, %c0_i32_127 : i32
    %c0_128 = arith.constant 0 : index
    %195 = arith.index_cast %194 : i32 to index
    %c0_129 = arith.constant 0 : index
    %c0_130 = arith.constant 0 : index
    %196 = vector.load %arg1[%c0_128, %195, %c0_129, %c0_130] : memref<1x9x9x16xbf16, #tpu.memory_space<vmem>>, vector<1x1x8x16xbf16>
    %197 = vector.shape_cast %196 : vector<1x1x8x16xbf16> to vector<1x8x16xbf16>
    %198 = vector.shape_cast %197 : vector<1x8x16xbf16> to vector<8x16xbf16>
    %c0_i32_131 = arith.constant 0 : i32
    %199 = arith.addi %c6_i32, %c0_i32_131 : i32
    %c0_132 = arith.constant 0 : index
    %200 = arith.index_cast %199 : i32 to index
    %c1_133 = arith.constant 1 : index
    %c0_134 = arith.constant 0 : index
    %201 = vector.load %arg1[%c0_132, %200, %c1_133, %c0_134] : memref<1x9x9x16xbf16, #tpu.memory_space<vmem>>, vector<1x1x8x16xbf16>
    %202 = vector.shape_cast %201 : vector<1x1x8x16xbf16> to vector<1x8x16xbf16>
    %203 = vector.shape_cast %202 : vector<1x8x16xbf16> to vector<8x16xbf16>
    %c1_i32_135 = arith.constant 1 : i32
    %204 = arith.addi %c6_i32, %c1_i32_135 : i32
    %c0_136 = arith.constant 0 : index
    %205 = arith.index_cast %204 : i32 to index
    %c0_137 = arith.constant 0 : index
    %c0_138 = arith.constant 0 : index
    %206 = vector.load %arg1[%c0_136, %205, %c0_137, %c0_138] : memref<1x9x9x16xbf16, #tpu.memory_space<vmem>>, vector<1x1x8x16xbf16>
    %207 = vector.shape_cast %206 : vector<1x1x8x16xbf16> to vector<1x8x16xbf16>
    %208 = vector.shape_cast %207 : vector<1x8x16xbf16> to vector<8x16xbf16>
    %c1_i32_139 = arith.constant 1 : i32
    %209 = arith.addi %c6_i32, %c1_i32_139 : i32
    %c0_140 = arith.constant 0 : index
    %210 = arith.index_cast %209 : i32 to index
    %c1_141 = arith.constant 1 : index
    %c0_142 = arith.constant 0 : index
    %211 = vector.load %arg1[%c0_140, %210, %c1_141, %c0_142] : memref<1x9x9x16xbf16, #tpu.memory_space<vmem>>, vector<1x1x8x16xbf16>
    %212 = vector.shape_cast %211 : vector<1x1x8x16xbf16> to vector<1x8x16xbf16>
    %213 = vector.shape_cast %212 : vector<1x8x16xbf16> to vector<8x16xbf16>
    %214 = tpu.concatenate %198, %203, %208, %213 in 1 : vector<8x16xbf16>, vector<8x16xbf16>, vector<8x16xbf16>, vector<8x16xbf16> -> vector<8x64xbf16>
    %cst_143 = arith.constant dense<0.000000e+00> : vector<8x8xf32>
    %215 = tpu.matmul %214, %0, %cst_143 {dimension_numbers = #tpu.dot_dimension_numbers<[1], [0], [0], [1], [0, 0, 1, 1], [], []>} : vector<8x64xbf16>, vector<64x8xbf16>, vector<8x8xf32> -> vector<8x8xf32>
    %216 = vector.broadcast %1 : vector<1x8xf32> to vector<8x8xf32>
    %217 = arith.addf %215, %216 : vector<8x8xf32>
    %cst_144 = arith.constant 0.000000e+00 : f32
    %218 = vector.broadcast %cst_144 : f32 to vector<8x8xf32>
    %219 = arith.maximumf %217, %218 : vector<8x8xf32>
    %220 = arith.truncf %219 : vector<8x8xf32> to vector<8x8xbf16>
    %221 = vector.shape_cast %220 : vector<8x8xbf16> to vector<1x8x8xbf16>
    %c0_145 = arith.constant 0 : index
    %222 = arith.index_cast %c6_i32 : i32 to index
    %c0_146 = arith.constant 0 : index
    %c0_147 = arith.constant 0 : index
    %223 = vector.load %arg4[%c0_145, %222, %c0_146, %c0_147] : memref<1x8x8x8xbf16, #tpu.memory_space<vmem>>, vector<1x1x8x8xbf16>
    %224 = vector.shape_cast %223 : vector<1x1x8x8xbf16> to vector<1x8x8xbf16>
    %225 = vector.shape_cast %221 : vector<1x8x8xbf16> to vector<1x1x8x8xbf16>
    tpu.vector_store %arg4[%c0_145, %222, %c0_146, %c0_147], %225 {strides = array<i32>} : memref<1x8x8x8xbf16, #tpu.memory_space<vmem>>, vector<1x1x8x8xbf16>,
    %c7_i32 = arith.constant 7 : i32
    %c0_i32_148 = arith.constant 0 : i32
    %226 = arith.addi %c7_i32, %c0_i32_148 : i32
    %c0_149 = arith.constant 0 : index
    %227 = arith.index_cast %226 : i32 to index
    %c0_150 = arith.constant 0 : index
    %c0_151 = arith.constant 0 : index
    %228 = vector.load %arg1[%c0_149, %227, %c0_150, %c0_151] : memref<1x9x9x16xbf16, #tpu.memory_space<vmem>>, vector<1x1x8x16xbf16>
    %229 = vector.shape_cast %228 : vector<1x1x8x16xbf16> to vector<1x8x16xbf16>
    %230 = vector.shape_cast %229 : vector<1x8x16xbf16> to vector<8x16xbf16>
    %c0_i32_152 = arith.constant 0 : i32
    %231 = arith.addi %c7_i32, %c0_i32_152 : i32
    %c0_153 = arith.constant 0 : index
    %232 = arith.index_cast %231 : i32 to index
    %c1_154 = arith.constant 1 : index
    %c0_155 = arith.constant 0 : index
    %233 = vector.load %arg1[%c0_153, %232, %c1_154, %c0_155] : memref<1x9x9x16xbf16, #tpu.memory_space<vmem>>, vector<1x1x8x16xbf16>
    %234 = vector.shape_cast %233 : vector<1x1x8x16xbf16> to vector<1x8x16xbf16>
    %235 = vector.shape_cast %234 : vector<1x8x16xbf16> to vector<8x16xbf16>
    %c1_i32_156 = arith.constant 1 : i32
    %236 = arith.addi %c7_i32, %c1_i32_156 : i32
    %c0_157 = arith.constant 0 : index
    %237 = arith.index_cast %236 : i32 to index
    %c0_158 = arith.constant 0 : index
    %c0_159 = arith.constant 0 : index
    %238 = vector.load %arg1[%c0_157, %237, %c0_158, %c0_159] : memref<1x9x9x16xbf16, #tpu.memory_space<vmem>>, vector<1x1x8x16xbf16>
    %239 = vector.shape_cast %238 : vector<1x1x8x16xbf16> to vector<1x8x16xbf16>
    %240 = vector.shape_cast %239 : vector<1x8x16xbf16> to vector<8x16xbf16>
    %c1_i32_160 = arith.constant 1 : i32
    %241 = arith.addi %c7_i32, %c1_i32_160 : i32
    %c0_161 = arith.constant 0 : index
    %242 = arith.index_cast %241 : i32 to index
    %c1_162 = arith.constant 1 : index
    %c0_163 = arith.constant 0 : index
    %243 = vector.load %arg1[%c0_161, %242, %c1_162, %c0_163] : memref<1x9x9x16xbf16, #tpu.memory_space<vmem>>, vector<1x1x8x16xbf16>
    %244 = vector.shape_cast %243 : vector<1x1x8x16xbf16> to vector<1x8x16xbf16>
    %245 = vector.shape_cast %244 : vector<1x8x16xbf16> to vector<8x16xbf16>
    %246 = tpu.concatenate %230, %235, %240, %245 in 1 : vector<8x16xbf16>, vector<8x16xbf16>, vector<8x16xbf16>, vector<8x16xbf16> -> vector<8x64xbf16>
    %cst_164 = arith.constant dense<0.000000e+00> : vector<8x8xf32>
    %247 = tpu.matmul %246, %0, %cst_164 {dimension_numbers = #tpu.dot_dimension_numbers<[1], [0], [0], [1], [0, 0, 1, 1], [], []>} : vector<8x64xbf16>, vector<64x8xbf16>, vector<8x8xf32> -> vector<8x8xf32>
    %248 = vector.broadcast %1 : vector<1x8xf32> to vector<8x8xf32>
    %249 = arith.addf %247, %248 : vector<8x8xf32>
    %cst_165 = arith.constant 0.000000e+00 : f32
    %250 = vector.broadcast %cst_165 : f32 to vector<8x8xf32>
    %251 = arith.maximumf %249, %250 : vector<8x8xf32>
    %252 = arith.truncf %251 : vector<8x8xf32> to vector<8x8xbf16>
    %253 = vector.shape_cast %252 : vector<8x8xbf16> to vector<1x8x8xbf16>
    %c0_166 = arith.constant 0 : index
    %254 = arith.index_cast %c7_i32 : i32 to index
    %c0_167 = arith.constant 0 : index
    %c0_168 = arith.constant 0 : index
    %255 = vector.load %arg4[%c0_166, %254, %c0_167, %c0_168] : memref<1x8x8x8xbf16, #tpu.memory_space<vmem>>, vector<1x1x8x8xbf16>
    %256 = vector.shape_cast %255 : vector<1x1x8x8xbf16> to vector<1x8x8xbf16>
    %257 = vector.shape_cast %253 : vector<1x8x8xbf16> to vector<1x1x8x8xbf16>
    tpu.vector_store %arg4[%c0_166, %254, %c0_167, %c0_168], %257 {strides = array<i32>} : memref<1x8x8x8xbf16, #tpu.memory_space<vmem>>, vector<1x1x8x8xbf16>,
    %c8_i32 = arith.constant 8 : i32
    return
  }
  func.func @transform_0(%arg0: i32) -> (i32, i32, i32, i32) {
    %c0_i32 = arith.constant 0 : i32
    %c0_i32_0 = arith.constant 0 : i32
    %c0_i32_1 = arith.constant 0 : i32
    %c0_i32_2 = arith.constant 0 : i32
    return %arg0, %c0_i32, %c0_i32_0, %c0_i32_1 : i32, i32, i32, i32
  }
  func.func @transform_1(%arg0: i32) -> (i32, i32) {
    %c0_i32 = arith.constant 0 : i32
    %c0_i32_0 = arith.constant 0 : i32
    %c0_i32_1 = arith.constant 0 : i32
    return %c0_i32, %c0_i32_0 : i32, i32
  }
  func.func @transform_2(%arg0: i32) -> (i32, i32) {
    %c0_i32 = arith.constant 0 : i32
    %c0_i32_0 = arith.constant 0 : i32
    %c0_i32_1 = arith.constant 0 : i32
    return %c0_i32, %c0_i32_0 : i32, i32
  }
  func.func @transform_3(%arg0: i32) -> (i32, i32, i32, i32) {
    %c0_i32 = arith.constant 0 : i32
    %c0_i32_0 = arith.constant 0 : i32
    %c0_i32_1 = arith.constant 0 : i32
    %c0_i32_2 = arith.constant 0 : i32
    return %arg0, %c0_i32, %c0_i32_0, %c0_i32_1 : i32, i32, i32, i32
  }
}

module attributes {stable_mosaic.version = 11 : i64} {
  func.func @_conv3x3_s2_relu_pool_proj_kernel(%arg0: i32, %arg1: memref<1x5x5x32xbf16, #tpu.memory_space<vmem>>, %arg2: memref<128x16xbf16, #tpu.memory_space<vmem>>, %arg3: memref<1x16xf32, #tpu.memory_space<vmem>>, %arg4: memref<16x32xbf16, #tpu.memory_space<vmem>>, %arg5: memref<1x32xf32, #tpu.memory_space<vmem>>, %arg6: memref<1x1x32xf32, #tpu.memory_space<vmem>>) attributes {dimension_semantics = [#tpu.dimension_semantics<parallel>], iteration_bounds = array<i64: 2>, scalar_prefetch = 0 : i64, scratch_operands = 0 : i64, tpu.core_type = #tpu.core_type<tc>, window_params = [{transform_indices = @transform_0, window_bounds = array<i64: 1, 5, 5, 32>}, {pipeline_mode = #tpu.pipeline_mode<synchronous>, transform_indices = @transform_1, window_bounds = array<i64: 128, 16>}, {pipeline_mode = #tpu.pipeline_mode<synchronous>, transform_indices = @transform_2, window_bounds = array<i64: 1, 16>}, {pipeline_mode = #tpu.pipeline_mode<synchronous>, transform_indices = @transform_3, window_bounds = array<i64: 16, 32>}, {pipeline_mode = #tpu.pipeline_mode<synchronous>, transform_indices = @transform_4, window_bounds = array<i64: 1, 32>}, {transform_indices = @transform_5, window_bounds = array<i64: 1, 1, 32>}]} {
    %c0 = arith.constant 0 : index
    %c0_0 = arith.constant 0 : index
    %0 = vector.load %arg2[%c0, %c0_0] : memref<128x16xbf16, #tpu.memory_space<vmem>>, vector<128x16xbf16>
    %c0_1 = arith.constant 0 : index
    %c0_2 = arith.constant 0 : index
    %1 = vector.load %arg3[%c0_1, %c0_2] : memref<1x16xf32, #tpu.memory_space<vmem>>, vector<1x16xf32>
    %cst = arith.constant 0.000000e+00 : f32
    %2 = vector.broadcast %cst : f32 to vector<1x16xf32>
    %c0_i32 = arith.constant 0 : i32
    %c0_i32_3 = arith.constant 0 : i32
    %3 = arith.addi %c0_i32, %c0_i32_3 : i32
    %c0_4 = arith.constant 0 : index
    %4 = arith.index_cast %3 : i32 to index
    %c0_5 = arith.constant 0 : index
    %c0_6 = arith.constant 0 : index
    %5 = vector.load %arg1[%c0_4, %4, %c0_5, %c0_6] : memref<1x5x5x32xbf16, #tpu.memory_space<vmem>>, vector<1x1x4x32xbf16>
    %6 = vector.shape_cast %5 : vector<1x1x4x32xbf16> to vector<1x4x32xbf16>
    %7 = vector.shape_cast %6 : vector<1x4x32xbf16> to vector<4x32xbf16>
    %c0_i32_7 = arith.constant 0 : i32
    %8 = arith.addi %c0_i32, %c0_i32_7 : i32
    %c0_8 = arith.constant 0 : index
    %9 = arith.index_cast %8 : i32 to index
    %c1 = arith.constant 1 : index
    %c0_9 = arith.constant 0 : index
    %10 = vector.load %arg1[%c0_8, %9, %c1, %c0_9] : memref<1x5x5x32xbf16, #tpu.memory_space<vmem>>, vector<1x1x4x32xbf16>
    %11 = vector.shape_cast %10 : vector<1x1x4x32xbf16> to vector<1x4x32xbf16>
    %12 = vector.shape_cast %11 : vector<1x4x32xbf16> to vector<4x32xbf16>
    %c1_i32 = arith.constant 1 : i32
    %13 = arith.addi %c0_i32, %c1_i32 : i32
    %c0_10 = arith.constant 0 : index
    %14 = arith.index_cast %13 : i32 to index
    %c0_11 = arith.constant 0 : index
    %c0_12 = arith.constant 0 : index
    %15 = vector.load %arg1[%c0_10, %14, %c0_11, %c0_12] : memref<1x5x5x32xbf16, #tpu.memory_space<vmem>>, vector<1x1x4x32xbf16>
    %16 = vector.shape_cast %15 : vector<1x1x4x32xbf16> to vector<1x4x32xbf16>
    %17 = vector.shape_cast %16 : vector<1x4x32xbf16> to vector<4x32xbf16>
    %c1_i32_13 = arith.constant 1 : i32
    %18 = arith.addi %c0_i32, %c1_i32_13 : i32
    %c0_14 = arith.constant 0 : index
    %19 = arith.index_cast %18 : i32 to index
    %c1_15 = arith.constant 1 : index
    %c0_16 = arith.constant 0 : index
    %20 = vector.load %arg1[%c0_14, %19, %c1_15, %c0_16] : memref<1x5x5x32xbf16, #tpu.memory_space<vmem>>, vector<1x1x4x32xbf16>
    %21 = vector.shape_cast %20 : vector<1x1x4x32xbf16> to vector<1x4x32xbf16>
    %22 = vector.shape_cast %21 : vector<1x4x32xbf16> to vector<4x32xbf16>
    %23 = tpu.concatenate %7, %12, %17, %22 in 1 : vector<4x32xbf16>, vector<4x32xbf16>, vector<4x32xbf16>, vector<4x32xbf16> -> vector<4x128xbf16>
    %cst_17 = arith.constant dense<0.000000e+00> : vector<4x16xf32>
    %24 = tpu.matmul %23, %0, %cst_17 {dimension_numbers = #tpu.dot_dimension_numbers<[1], [0], [0], [1], [0, 0, 1, 1], [], []>} : vector<4x128xbf16>, vector<128x16xbf16>, vector<4x16xf32> -> vector<4x16xf32>
    %25 = vector.broadcast %1 : vector<1x16xf32> to vector<4x16xf32>
    %26 = arith.addf %24, %25 : vector<4x16xf32>
    %cst_18 = arith.constant 0.000000e+00 : f32
    %27 = vector.broadcast %cst_18 : f32 to vector<4x16xf32>
    %28 = arith.maximumf %26, %27 : vector<4x16xf32>
    %cst_19 = arith.constant dense<0.000000e+00> : vector<16xf32>
    %29 = vector.multi_reduction <add>, %28, %cst_19 [0] : vector<4x16xf32> to vector<16xf32>
    %30 = vector.shape_cast %29 : vector<16xf32> to vector<1x16xf32>
    %31 = arith.addf %2, %30 : vector<1x16xf32>
    %c1_i32_20 = arith.constant 1 : i32
    %c0_i32_21 = arith.constant 0 : i32
    %32 = arith.addi %c1_i32_20, %c0_i32_21 : i32
    %c0_22 = arith.constant 0 : index
    %33 = arith.index_cast %32 : i32 to index
    %c0_23 = arith.constant 0 : index
    %c0_24 = arith.constant 0 : index
    %34 = vector.load %arg1[%c0_22, %33, %c0_23, %c0_24] : memref<1x5x5x32xbf16, #tpu.memory_space<vmem>>, vector<1x1x4x32xbf16>
    %35 = vector.shape_cast %34 : vector<1x1x4x32xbf16> to vector<1x4x32xbf16>
    %36 = vector.shape_cast %35 : vector<1x4x32xbf16> to vector<4x32xbf16>
    %c0_i32_25 = arith.constant 0 : i32
    %37 = arith.addi %c1_i32_20, %c0_i32_25 : i32
    %c0_26 = arith.constant 0 : index
    %38 = arith.index_cast %37 : i32 to index
    %c1_27 = arith.constant 1 : index
    %c0_28 = arith.constant 0 : index
    %39 = vector.load %arg1[%c0_26, %38, %c1_27, %c0_28] : memref<1x5x5x32xbf16, #tpu.memory_space<vmem>>, vector<1x1x4x32xbf16>
    %40 = vector.shape_cast %39 : vector<1x1x4x32xbf16> to vector<1x4x32xbf16>
    %41 = vector.shape_cast %40 : vector<1x4x32xbf16> to vector<4x32xbf16>
    %c1_i32_29 = arith.constant 1 : i32
    %42 = arith.addi %c1_i32_20, %c1_i32_29 : i32
    %c0_30 = arith.constant 0 : index
    %43 = arith.index_cast %42 : i32 to index
    %c0_31 = arith.constant 0 : index
    %c0_32 = arith.constant 0 : index
    %44 = vector.load %arg1[%c0_30, %43, %c0_31, %c0_32] : memref<1x5x5x32xbf16, #tpu.memory_space<vmem>>, vector<1x1x4x32xbf16>
    %45 = vector.shape_cast %44 : vector<1x1x4x32xbf16> to vector<1x4x32xbf16>
    %46 = vector.shape_cast %45 : vector<1x4x32xbf16> to vector<4x32xbf16>
    %c1_i32_33 = arith.constant 1 : i32
    %47 = arith.addi %c1_i32_20, %c1_i32_33 : i32
    %c0_34 = arith.constant 0 : index
    %48 = arith.index_cast %47 : i32 to index
    %c1_35 = arith.constant 1 : index
    %c0_36 = arith.constant 0 : index
    %49 = vector.load %arg1[%c0_34, %48, %c1_35, %c0_36] : memref<1x5x5x32xbf16, #tpu.memory_space<vmem>>, vector<1x1x4x32xbf16>
    %50 = vector.shape_cast %49 : vector<1x1x4x32xbf16> to vector<1x4x32xbf16>
    %51 = vector.shape_cast %50 : vector<1x4x32xbf16> to vector<4x32xbf16>
    %52 = tpu.concatenate %36, %41, %46, %51 in 1 : vector<4x32xbf16>, vector<4x32xbf16>, vector<4x32xbf16>, vector<4x32xbf16> -> vector<4x128xbf16>
    %cst_37 = arith.constant dense<0.000000e+00> : vector<4x16xf32>
    %53 = tpu.matmul %52, %0, %cst_37 {dimension_numbers = #tpu.dot_dimension_numbers<[1], [0], [0], [1], [0, 0, 1, 1], [], []>} : vector<4x128xbf16>, vector<128x16xbf16>, vector<4x16xf32> -> vector<4x16xf32>
    %54 = vector.broadcast %1 : vector<1x16xf32> to vector<4x16xf32>
    %55 = arith.addf %53, %54 : vector<4x16xf32>
    %cst_38 = arith.constant 0.000000e+00 : f32
    %56 = vector.broadcast %cst_38 : f32 to vector<4x16xf32>
    %57 = arith.maximumf %55, %56 : vector<4x16xf32>
    %cst_39 = arith.constant dense<0.000000e+00> : vector<16xf32>
    %58 = vector.multi_reduction <add>, %57, %cst_39 [0] : vector<4x16xf32> to vector<16xf32>
    %59 = vector.shape_cast %58 : vector<16xf32> to vector<1x16xf32>
    %60 = arith.addf %31, %59 : vector<1x16xf32>
    %c2_i32 = arith.constant 2 : i32
    %c0_i32_40 = arith.constant 0 : i32
    %61 = arith.addi %c2_i32, %c0_i32_40 : i32
    %c0_41 = arith.constant 0 : index
    %62 = arith.index_cast %61 : i32 to index
    %c0_42 = arith.constant 0 : index
    %c0_43 = arith.constant 0 : index
    %63 = vector.load %arg1[%c0_41, %62, %c0_42, %c0_43] : memref<1x5x5x32xbf16, #tpu.memory_space<vmem>>, vector<1x1x4x32xbf16>
    %64 = vector.shape_cast %63 : vector<1x1x4x32xbf16> to vector<1x4x32xbf16>
    %65 = vector.shape_cast %64 : vector<1x4x32xbf16> to vector<4x32xbf16>
    %c0_i32_44 = arith.constant 0 : i32
    %66 = arith.addi %c2_i32, %c0_i32_44 : i32
    %c0_45 = arith.constant 0 : index
    %67 = arith.index_cast %66 : i32 to index
    %c1_46 = arith.constant 1 : index
    %c0_47 = arith.constant 0 : index
    %68 = vector.load %arg1[%c0_45, %67, %c1_46, %c0_47] : memref<1x5x5x32xbf16, #tpu.memory_space<vmem>>, vector<1x1x4x32xbf16>
    %69 = vector.shape_cast %68 : vector<1x1x4x32xbf16> to vector<1x4x32xbf16>
    %70 = vector.shape_cast %69 : vector<1x4x32xbf16> to vector<4x32xbf16>
    %c1_i32_48 = arith.constant 1 : i32
    %71 = arith.addi %c2_i32, %c1_i32_48 : i32
    %c0_49 = arith.constant 0 : index
    %72 = arith.index_cast %71 : i32 to index
    %c0_50 = arith.constant 0 : index
    %c0_51 = arith.constant 0 : index
    %73 = vector.load %arg1[%c0_49, %72, %c0_50, %c0_51] : memref<1x5x5x32xbf16, #tpu.memory_space<vmem>>, vector<1x1x4x32xbf16>
    %74 = vector.shape_cast %73 : vector<1x1x4x32xbf16> to vector<1x4x32xbf16>
    %75 = vector.shape_cast %74 : vector<1x4x32xbf16> to vector<4x32xbf16>
    %c1_i32_52 = arith.constant 1 : i32
    %76 = arith.addi %c2_i32, %c1_i32_52 : i32
    %c0_53 = arith.constant 0 : index
    %77 = arith.index_cast %76 : i32 to index
    %c1_54 = arith.constant 1 : index
    %c0_55 = arith.constant 0 : index
    %78 = vector.load %arg1[%c0_53, %77, %c1_54, %c0_55] : memref<1x5x5x32xbf16, #tpu.memory_space<vmem>>, vector<1x1x4x32xbf16>
    %79 = vector.shape_cast %78 : vector<1x1x4x32xbf16> to vector<1x4x32xbf16>
    %80 = vector.shape_cast %79 : vector<1x4x32xbf16> to vector<4x32xbf16>
    %81 = tpu.concatenate %65, %70, %75, %80 in 1 : vector<4x32xbf16>, vector<4x32xbf16>, vector<4x32xbf16>, vector<4x32xbf16> -> vector<4x128xbf16>
    %cst_56 = arith.constant dense<0.000000e+00> : vector<4x16xf32>
    %82 = tpu.matmul %81, %0, %cst_56 {dimension_numbers = #tpu.dot_dimension_numbers<[1], [0], [0], [1], [0, 0, 1, 1], [], []>} : vector<4x128xbf16>, vector<128x16xbf16>, vector<4x16xf32> -> vector<4x16xf32>
    %83 = vector.broadcast %1 : vector<1x16xf32> to vector<4x16xf32>
    %84 = arith.addf %82, %83 : vector<4x16xf32>
    %cst_57 = arith.constant 0.000000e+00 : f32
    %85 = vector.broadcast %cst_57 : f32 to vector<4x16xf32>
    %86 = arith.maximumf %84, %85 : vector<4x16xf32>
    %cst_58 = arith.constant dense<0.000000e+00> : vector<16xf32>
    %87 = vector.multi_reduction <add>, %86, %cst_58 [0] : vector<4x16xf32> to vector<16xf32>
    %88 = vector.shape_cast %87 : vector<16xf32> to vector<1x16xf32>
    %89 = arith.addf %60, %88 : vector<1x16xf32>
    %c3_i32 = arith.constant 3 : i32
    %c0_i32_59 = arith.constant 0 : i32
    %90 = arith.addi %c3_i32, %c0_i32_59 : i32
    %c0_60 = arith.constant 0 : index
    %91 = arith.index_cast %90 : i32 to index
    %c0_61 = arith.constant 0 : index
    %c0_62 = arith.constant 0 : index
    %92 = vector.load %arg1[%c0_60, %91, %c0_61, %c0_62] : memref<1x5x5x32xbf16, #tpu.memory_space<vmem>>, vector<1x1x4x32xbf16>
    %93 = vector.shape_cast %92 : vector<1x1x4x32xbf16> to vector<1x4x32xbf16>
    %94 = vector.shape_cast %93 : vector<1x4x32xbf16> to vector<4x32xbf16>
    %c0_i32_63 = arith.constant 0 : i32
    %95 = arith.addi %c3_i32, %c0_i32_63 : i32
    %c0_64 = arith.constant 0 : index
    %96 = arith.index_cast %95 : i32 to index
    %c1_65 = arith.constant 1 : index
    %c0_66 = arith.constant 0 : index
    %97 = vector.load %arg1[%c0_64, %96, %c1_65, %c0_66] : memref<1x5x5x32xbf16, #tpu.memory_space<vmem>>, vector<1x1x4x32xbf16>
    %98 = vector.shape_cast %97 : vector<1x1x4x32xbf16> to vector<1x4x32xbf16>
    %99 = vector.shape_cast %98 : vector<1x4x32xbf16> to vector<4x32xbf16>
    %c1_i32_67 = arith.constant 1 : i32
    %100 = arith.addi %c3_i32, %c1_i32_67 : i32
    %c0_68 = arith.constant 0 : index
    %101 = arith.index_cast %100 : i32 to index
    %c0_69 = arith.constant 0 : index
    %c0_70 = arith.constant 0 : index
    %102 = vector.load %arg1[%c0_68, %101, %c0_69, %c0_70] : memref<1x5x5x32xbf16, #tpu.memory_space<vmem>>, vector<1x1x4x32xbf16>
    %103 = vector.shape_cast %102 : vector<1x1x4x32xbf16> to vector<1x4x32xbf16>
    %104 = vector.shape_cast %103 : vector<1x4x32xbf16> to vector<4x32xbf16>
    %c1_i32_71 = arith.constant 1 : i32
    %105 = arith.addi %c3_i32, %c1_i32_71 : i32
    %c0_72 = arith.constant 0 : index
    %106 = arith.index_cast %105 : i32 to index
    %c1_73 = arith.constant 1 : index
    %c0_74 = arith.constant 0 : index
    %107 = vector.load %arg1[%c0_72, %106, %c1_73, %c0_74] : memref<1x5x5x32xbf16, #tpu.memory_space<vmem>>, vector<1x1x4x32xbf16>
    %108 = vector.shape_cast %107 : vector<1x1x4x32xbf16> to vector<1x4x32xbf16>
    %109 = vector.shape_cast %108 : vector<1x4x32xbf16> to vector<4x32xbf16>
    %110 = tpu.concatenate %94, %99, %104, %109 in 1 : vector<4x32xbf16>, vector<4x32xbf16>, vector<4x32xbf16>, vector<4x32xbf16> -> vector<4x128xbf16>
    %cst_75 = arith.constant dense<0.000000e+00> : vector<4x16xf32>
    %111 = tpu.matmul %110, %0, %cst_75 {dimension_numbers = #tpu.dot_dimension_numbers<[1], [0], [0], [1], [0, 0, 1, 1], [], []>} : vector<4x128xbf16>, vector<128x16xbf16>, vector<4x16xf32> -> vector<4x16xf32>
    %112 = vector.broadcast %1 : vector<1x16xf32> to vector<4x16xf32>
    %113 = arith.addf %111, %112 : vector<4x16xf32>
    %cst_76 = arith.constant 0.000000e+00 : f32
    %114 = vector.broadcast %cst_76 : f32 to vector<4x16xf32>
    %115 = arith.maximumf %113, %114 : vector<4x16xf32>
    %cst_77 = arith.constant dense<0.000000e+00> : vector<16xf32>
    %116 = vector.multi_reduction <add>, %115, %cst_77 [0] : vector<4x16xf32> to vector<16xf32>
    %117 = vector.shape_cast %116 : vector<16xf32> to vector<1x16xf32>
    %118 = arith.addf %89, %117 : vector<1x16xf32>
    %c4_i32 = arith.constant 4 : i32
    %cst_78 = arith.constant 6.250000e-02 : f32
    %119 = vector.broadcast %cst_78 : f32 to vector<1x16xf32>
    %120 = arith.mulf %118, %119 : vector<1x16xf32>
    %121 = arith.truncf %120 : vector<1x16xf32> to vector<1x16xbf16>
    %c0_79 = arith.constant 0 : index
    %c0_80 = arith.constant 0 : index
    %122 = vector.load %arg4[%c0_79, %c0_80] : memref<16x32xbf16, #tpu.memory_space<vmem>>, vector<16x32xbf16>
    %cst_81 = arith.constant dense<0.000000e+00> : vector<1x32xf32>
    %123 = tpu.matmul %121, %122, %cst_81 {dimension_numbers = #tpu.dot_dimension_numbers<[1], [0], [0], [1], [0, 0, 1, 1], [], []>} : vector<1x16xbf16>, vector<16x32xbf16>, vector<1x32xf32> -> vector<1x32xf32>
    %c0_82 = arith.constant 0 : index
    %c0_83 = arith.constant 0 : index
    %124 = vector.load %arg5[%c0_82, %c0_83] : memref<1x32xf32, #tpu.memory_space<vmem>>, vector<1x32xf32>
    %125 = arith.addf %123, %124 : vector<1x32xf32>
    %c0_84 = arith.constant 0 : index
    %c0_85 = arith.constant 0 : index
    %c0_86 = arith.constant 0 : index
    %126 = vector.load %arg6[%c0_84, %c0_85, %c0_86] : memref<1x1x32xf32, #tpu.memory_space<vmem>>, vector<1x1x32xf32>
    %127 = vector.shape_cast %126 : vector<1x1x32xf32> to vector<1x32xf32>
    %128 = vector.shape_cast %125 : vector<1x32xf32> to vector<1x1x32xf32>
    tpu.vector_store %arg6[%c0_84, %c0_85, %c0_86], %128 {strides = array<i32>} : memref<1x1x32xf32, #tpu.memory_space<vmem>>, vector<1x1x32xf32>,
    return
  }
  func.func @transform_0(%arg0: i32) -> (i32, i32, i32, i32) {
    %c0_i32 = arith.constant 0 : i32
    %c0_i32_0 = arith.constant 0 : i32
    %c0_i32_1 = arith.constant 0 : i32
    %c0_i32_2 = arith.constant 0 : i32
    return %arg0, %c0_i32, %c0_i32_0, %c0_i32_1 : i32, i32, i32, i32
  }
  func.func @transform_1(%arg0: i32) -> (i32, i32) {
    %c0_i32 = arith.constant 0 : i32
    %c0_i32_0 = arith.constant 0 : i32
    %c0_i32_1 = arith.constant 0 : i32
    return %c0_i32, %c0_i32_0 : i32, i32
  }
  func.func @transform_2(%arg0: i32) -> (i32, i32) {
    %c0_i32 = arith.constant 0 : i32
    %c0_i32_0 = arith.constant 0 : i32
    %c0_i32_1 = arith.constant 0 : i32
    return %c0_i32, %c0_i32_0 : i32, i32
  }
  func.func @transform_3(%arg0: i32) -> (i32, i32) {
    %c0_i32 = arith.constant 0 : i32
    %c0_i32_0 = arith.constant 0 : i32
    %c0_i32_1 = arith.constant 0 : i32
    return %c0_i32, %c0_i32_0 : i32, i32
  }
  func.func @transform_4(%arg0: i32) -> (i32, i32) {
    %c0_i32 = arith.constant 0 : i32
    %c0_i32_0 = arith.constant 0 : i32
    %c0_i32_1 = arith.constant 0 : i32
    return %c0_i32, %c0_i32_0 : i32, i32
  }
  func.func @transform_5(%arg0: i32) -> (i32, i32, i32) {
    %c0_i32 = arith.constant 0 : i32
    %c0_i32_0 = arith.constant 0 : i32
    %c0_i32_1 = arith.constant 0 : i32
    return %arg0, %c0_i32, %c0_i32_0 : i32, i32, i32
  }
}

</mosaic_0001>

<bundles_post_ra>
// kernel: gesture_backbone_forward.2
= control target key start
LH: loop header
LB: loop body
LE: loop exit
PB: predicated region body
PF: predicated region fallthrough
CT: control target
= control target key end

     0   :  { %s923_s12 = smov 0   ;;  %s1095_s0 = inlined_call_operand.vmem [shape: bf16[2,9,9,16], index: 0, kind: input, shape index: {}]   ;;  %s1096_s1 = inlined_call_operand.vmem [shape: bf16[64,8], index: 1, kind: input, shape index: {}]   ;;  %s1097_s2 = inlined_call_operand.vmem [shape: f32[1,8], index: 2, kind: input, shape index: {}]   ;;  %s1098_s3 = inlined_call_operand.vmem [shape: bf16[2,8,8,8], index: 3, kind: output, shape index: {}]  }
   0x1 LB: > { %s763_s13 = sadd.s32 4294967295, %s898_s12   ;;  %p767_p0 = scmp.ge.s32.totalorder %s898_s12, 1  ;;  %s898_s12 = sphi %s923_s12, %s13_s12  }
   0x2   : > { %p137_p1 = scmp.lt.s32.totalorder %s898_s12, 3 }
   0x4   : > { %p138_p2 = pnand %p767_p0, %p137_p1 }
   0x5   : > { %p161_p3 = scmp.lt.s32.totalorder (!%p138_p2), %s763_s13, 1  ;;  %s900_s18 = smov (!%p138_p2), 32  }
   0x6   : > { %141 = sbr.rel (%p138_p2) target bundleno = 332 (0x14c), region = 32  ;;  %s901_s19 = smov (!%p138_p2), 16  }
   0x7   : > { %s902_s20 = smov (!%p138_p2), 48  }
   0xb   : > { %s1100_s13 = smov (!%p161_p3, %s763_s13), 1  ;;  %vm217_vm0 = vcmask 130048   ;;  %vm221_vm1 = vcmask 261120   ;;  %vm224_vm2 = vcmask 392192   ;;  %vm254_vm3 = vcmask 523264  }
   0xc   : > { %s879_s14 = smul.u32 72, %s1100_s13  ;;  %s866_s4 = sshll.u32 %s1100_s13, 5  ;;  %vm272_vm4 = vcmask 60416  }
   0xd   : > { %s1074_s7 = scalar_lea.vmem %s1098_s3, %s866_s4 }
   0xe   : > { %s937_s17 = scalar_lea.vmem %s1095_s0, %s879_s14 }
   0xf   : > { %v806_v0 = vld [vmem:[%s937_s17 + $0x18] sm:$0xf]  ;;  %v807_v1 = vld [vmem:[%s937_s17 + $0x1c] sm:$0x1]  ;;  %v810_v2 = vld [vmem:[%s937_s17 + $0x10] sm:$0xf] }
  0x10   : > { %v356_v3 = vunpack.c.l.b16 %v806_v0  ;;  %v873_v4 = vld [vmem:[%s937_s17 + $0x10] sm:$0x10]  ;;  %v816_v5 = vld [vmem:[%s937_s17 + $0x20] sm:$0xf]  ;;  %v820_v6 = vld [vmem:[%s937_s17 + $0x18] sm:$0xf]  ;;  %v361_v7 = vunpack.c.l.b16 %v807_v1 }
  0x11   : > { %v811_v8 = vor.u32 %v873_v4, %v810_v2  ;;  %v874_v9 = vld [vmem:[%s937_s17 + $0x18] sm:$0x10]  ;;  %v800_v10 = vld [vmem:[%s937_s17 + $0x8] sm:$0xf]  ;;  %v872_v11 = vld [vmem:[%s937_s17 + $0x8] sm:$0x10]  ;;  %v418_v17 = vunpack.c.l.b16 %v816_v5 }
  0x12   : > { %v357_v12 = vpack.c.b16 %v356_v3, %v356_v3  ;;  %v821_v13 = vor.u32 %v874_v9, %v820_v6  ;;  %v771_v14 = vld [vmem:[%s937_s17 + $0x8] sm:$0xf]  ;;  %v801_v18 = vor.u32 %v872_v11, %v800_v10  ;;  %v775_v19 = vld [vmem:[%s937_s17] sm:$0xf]  ;;  %v362_v20 = vpack.c.b16 %v361_v7, %v356_v3  ;;  %v871_v23 = vld [vmem:[%s937_s17] sm:$0x10] }
  0x13   : > { %v347_v15 = vshrl.u32 %v811_v8, 16  ;;  %v349_v16 = vshll.u32 %v811_v8, 16  ;;  %v772_v24 = vld [vmem:[%s937_s17 + $0xc] sm:$0x1]  ;;  %v201_v25 = vunpack.c.l.b16 %v771_v14  ;;  %v817_v28 = vld [vmem:[%s937_s17 + $0x24] sm:$0x1]  ;;  %v419_v29 = vpack.c.b16 %v418_v17, %v418_v17 }
  0x14   : > { %358 = vrot.lane.b32.xlu1 %v357_v12, %s900_s18  ;;  %v411_v22 = vshll.u32 %v821_v13, 16  ;;  %v287_v30 = vshll.u32 %v801_v18, 16  ;;  %v776_v31 = vor.u32 %v871_v23, %v775_v19  ;;  %v206_v32 = vunpack.c.l.b16 %v772_v24  ;;  %v796_v45 = vld [vmem:[%s937_s17 + $0x10] sm:$0xf]  ;;  %v797_v48 = vld [vmem:[%s937_s17 + $0x14] sm:$0x1] }
  0x15   : > { %v351_v21 = vrot.slane %v349_v16, 1  ;;  %v202_v27 = vpack.c.b16 %v201_v25, %v201_v25  ;;  %v409_v33 = vshrl.u32 %v821_v13, 16  ;;  %v364_v35 = vshrl.u32 %v362_v20, 16  ;;  %v860_v52 = vld [vmem:[%s937_s17 + $0x38] sm:$0xf] }
  0x16   : > { %v413_v34 = vrot.slane %v411_v22, 1  ;;  %v366_v36 = vshll.u32 %v362_v20, 16  ;;  %v423_v37 = vunpack.c.l.b16 %v817_v28  ;;  %v285_v39 = vshrl.u32 %v801_v18, 16  ;;  %v878_v56 = vld [vmem:[%s937_s17 + $0x38] sm:$0x10] }
  0x17   : > { %v352_v26 = vor.u32 %v351_v21, %v347_v15  ;;  %203 = vrot.lane.b32.xlu2 %v202_v27, %s900_s18  ;;  %v289_v40 = vrot.slane %v287_v30, 1  ;;  %v207_v41 = vpack.c.b16 %v206_v32, %v201_v25  ;;  %v194_v44 = vshll.u32 %v776_v31, 16  ;;  %v846_v1 = vld [vmem:[%s937_s17 + $0x38] sm:$0xf]  ;;  %v847_v2 = vld [vmem:[%s937_s17 + $0x3c] sm:$0x1] }
  0x18   : > { %v368_v38 = vrot.slane %v366_v36, 1  ;;  %v424_v42 = vpack.c.b16 %v423_v37, %v418_v17  ;;  %v414_v43 = vor.u32 %v413_v34, %v409_v33  ;;  %v294_v51 = vunpack.c.l.b16 %v796_v45  ;;  %v850_v4 = vld [vmem:[%s937_s17 + $0x30] sm:$0xf]  ;;  %v877_v5 = vld [vmem:[%s937_s17 + $0x30] sm:$0x10] }
  0x19   : > { %353 = vrot.lane.b32.xlu0 %v352_v26, %s901_s19  ;;  %v290_v49 = vor.u32 %v289_v40, %v285_v39  ;;  %v211_v50 = vshll.u32 %v207_v41, 16  ;;  %v299_v53 = vunpack.c.l.b16 %v797_v48  ;;  %v192_v54 = vshrl.u32 %v776_v31, 16  ;;  %v856_v18 = vld [vmem:[%s937_s17 + $0x40] sm:$0xf]  ;;  %v857_v20 = vld [vmem:[%s937_s17 + $0x44] sm:$0x1] }
  0x1a   : > { %v369_v46 = vor.u32 %v368_v38, %v364_v35  ;;  %v428_v47 = vshll.u32 %v424_v42, 16  ;;  %v196_v55 = vrot.slane %v194_v44, 1  ;;  %v426_v57 = vshrl.u32 %v424_v42, 16  ;;  %v840_v24 = vld [vmem:[%s937_s17 + $0x28] sm:$0xf]  ;;  %v986_v31 = vld [vmem:[%s1096_s1 + $0x10] sm:$0xff] }
  0x1b   : > { %v300_v59 = vpack.c.b16 %v299_v53, %v294_v51  ;;  %v209_v60 = vshrl.u32 %v207_v41, 16  ;;  %v213_v61 = vrot.slane %v211_v50, 1  ;;  %v861_v62 = vor.u32 %v878_v56, %v860_v52  ;;  %v876_v28 = vld [vmem:[%s937_s17 + $0x28] sm:$0x10]  ;;  %v826_v36 = vld [vmem:[%s937_s17 + $0x28] sm:$0xf] }
  0x1c   : > { %420 = vrot.lane.b32.xlu1 %v419_v29, %s900_s18  ;;  %v430_v58 = vrot.slane %v428_v47, 1  ;;  %v197_v63 = vor.u32 %v196_v55, %v192_v54  ;;  %v604_v8 = vunpack.c.l.b16 %v846_v1  ;;  %v609_v9 = vunpack.c.l.b16 %v847_v2  ;;  %v980_v29 = vld [vmem:[%s1096_s1 + $0x18] sm:$0xff]  ;;  %v827_v37 = vld [vmem:[%s937_s17 + $0x2c] sm:$0x1]  ;;  %v830_v40 = vld [vmem:[%s937_s17 + $0x20] sm:$0xf] }
  0x1d   : > { %v304_v3 = vshll.u32 %v300_v59, 16  ;;  %v214_v6 = vor.u32 %v213_v61, %v209_v60  ;;  %v659_v7 = vshll.u32 %v861_v62, 16  ;;  %v851_v10 = vor.u32 %v877_v5, %v850_v4  ;;  %385 = vmatpush.bf16.msra.mxu2 %v980_v29  ;;  %447 = vmatpush.bf16.msra.mxu3 %v980_v29  ;;  %v875_v41 = vld [vmem:[%s937_s17 + $0x20] sm:$0x10]  ;;  %v836_v53 = vld [vmem:[%s937_s17 + $0x30] sm:$0xf] }
  0x1e   : > { %v431_v0 = vor.u32 %v430_v58, %v426_v57  ;;  %v302_v11 = vshrl.u32 %v300_v59, 16  ;;  %v657_v13 = vshrl.u32 %v861_v62, 16  ;;  %v610_v15 = vpack.c.b16 %v609_v9, %v604_v8  ;;  %261 = vmatpush.bf16.msra.mxu0 %v980_v29  ;;  %323 = vmatpush.bf16.msra.mxu1 %v980_v29 }
  0x1f   : > { %370 = vrot.lane.b32.xlu2 %v369_v46, %s902_s20  ;;  %v306_v12 = vrot.slane %v304_v3, 1  ;;  %v661_v14 = vrot.slane %v659_v7, 1  ;;  %v295_v16 = vpack.c.b16 %v294_v51, %v294_v51  ;;  %v597_v17 = vshll.u32 %v851_v10, 16 }
  0x20   : > { %v614_v22 = vshll.u32 %v610_v15, 16  ;;  %v666_v23 = vunpack.c.l.b16 %v856_v18  ;;  %v671_v25 = vunpack.c.l.b16 %v857_v20  ;;  %v595_v26 = vshrl.u32 %v851_v10, 16  ;;  %v868_v10 = vld [vmem:[%s1096_s1 + $0x8] sm:$0xff] }
  0x21   : > { %415 = vrot.lane.b32.xlu0 %v414_v43, %s901_s19  ;;  %v307_v19 = vor.u32 %v306_v12, %v302_v11  ;;  %v662_v21 = vor.u32 %v661_v14, %v657_v13  ;;  %v599_v27 = vrot.slane %v597_v17, 1  ;;  %v612_v32 = vshrl.u32 %v610_v15, 16  ;;  %386 = vmatpush.bf16.msra.mxu2 %v986_v31  ;;  %v867_v11 = vld [vmem:[%s1096_s1] sm:$0xff]  ;;  %v804_v15 = vld [vmem:[%s937_s17 + $0x10] sm:$0xf] }
  0x22   : > { %v672_v30 = vpack.c.b16 %v671_v25, %v666_v23  ;;  %v616_v33 = vrot.slane %v614_v22, 1  ;;  %v841_v34 = vor.u32 %v876_v28, %v840_v24  ;;  %v605_v38 = vpack.c.b16 %v604_v8, %v604_v8  ;;  %448 = vmatpush.bf16.msra.mxu3 %v986_v31  ;;  %262 = vmatpush.bf16.msra.mxu0 %v986_v31  ;;  %v181_v28 = vld [vmem:[%s937_s17] sm:$0xf] }
  0x23   : > { %v600_v35 = vor.u32 %v599_v27, %v595_v26  ;;  %v480_v44 = vunpack.c.l.b16 %v826_v36  ;;  %v485_v45 = vunpack.c.l.b16 %v827_v37  ;;  %v831_v46 = vor.u32 %v875_v41, %v830_v40  ;;  %324 = vmatpush.bf16.msra.mxu1 %v986_v31 }
  0x24   : > { %291 = vrot.lane.b32.xlu1 %v290_v49, %s901_s19  ;;  %v676_v39 = vshll.u32 %v672_v30, 16  ;;  %v617_v42 = vor.u32 %v616_v33, %v612_v32  ;;  %v535_v43 = vshll.u32 %v841_v34, 16  ;;  %v674_v47 = vshrl.u32 %v672_v30, 16  ;;  %v837_v49 = vld [vmem:[%s937_s17 + $0x34] sm:$0x1] }
  0x25   : > { %v533_v50 = vshrl.u32 %v841_v34, 16  ;;  %v486_v52 = vpack.c.b16 %v485_v45, %v480_v44  ;;  %v667_v54 = vpack.c.b16 %v666_v23, %v666_v23  ;;  %v473_v55 = vshll.u32 %v831_v46, 16  ;;  %387 = vmatpush.bf16.msra.mxu2 %v868_v10 }
  0x26   : > { %v678_v48 = vrot.slane %v676_v39, 1  ;;  %v537_v51 = vrot.slane %v535_v43, 1  ;;  %v547_v57 = vunpack.c.l.b16 %v837_v49  ;;  %v542_v58 = vunpack.c.l.b16 %v836_v53  ;;  %449 = vmatpush.bf16.msra.mxu3 %v868_v10  ;;  %263 = vmatpush.bf16.msra.mxu0 %v868_v10  ;;  %v854_v49 = vld [vmem:[%s937_s17 + $0x38] sm:$0xf] }
  0x27   : > { %432 = vrot.lane.b32.xlu2 %v431_v0, %s902_s20  ;;  %v490_v60 = vshll.u32 %v486_v52, 16  ;;  %v471_v61 = vshrl.u32 %v831_v46, 16  ;;  %v475_v62 = vrot.slane %v473_v55, 1  ;;  %v488_v0 = vshrl.u32 %v486_v52, 16  ;;  %325 = vmatpush.bf16.msra.mxu1 %v868_v10 }
  0x28   : > { %v679_v56 = vor.u32 %v678_v48, %v674_v47  ;;  %v538_v59 = vor.u32 %v537_v51, %v533_v50  ;;  %v481_v3 = vpack.c.b16 %v480_v44, %v480_v44  ;;  %v543_v8 = vpack.c.b16 %v542_v58, %v542_v58 }
  0x29   : > { %198 = vrot.lane.b32.xlu0 %v197_v63, %s901_s19  ;;  %v548_v63 = vpack.c.b16 %v547_v57, %v542_v58  ;;  %v492_v1 = vrot.slane %v490_v60, 1  ;;  %v476_v2 = vor.u32 %v475_v62, %v471_v61  ;;  %388 = vmatpush.bf16.msra.mxu2 %v867_v11  ;;  %v834_v62 = vld [vmem:[%s937_s17 + $0x28] sm:$0xf] }
  0x2a   : > { %450 = vmatpush.bf16.msra.mxu3 %v867_v11  ;;  %264 = vmatpush.bf16.msra.mxu0 %v867_v11 }
  0x2b   : > { %v552_v4 = vshll.u32 %v548_v63, 16  ;;  %v493_v5 = vor.u32 %v492_v1, %v488_v0  ;;  %326 = vmatpush.bf16.msra.mxu1 %v867_v11 }
  0x2c   : > { %215 = vrot.lane.b32.xlu1 %v214_v6, %s902_s20  ;;  %v550_v6 = vshrl.u32 %v548_v63, 16 }
  0x2d   : > { %v554_v7 = vrot.slane %v552_v4, 1  ;;  %633 = vmatpush.bf16.msrb.mxu2 %v980_v29  ;;  %v891_v4 = vld [vmem:[%s1097_s2] ss:$0 sm:$0xff] }
  0x2e   : > { %695 = vmatpush.bf16.msrb.mxu3 %v980_v29  ;;  %509 = vmatpush.bf16.msrb.mxu0 %v980_v29 }
  0x2f   : > { %308 = vrot.lane.b32.xlu2 %v307_v19, %s902_s20  ;;  %v555_v9 = vor.u32 %v554_v7, %v550_v6  ;;  %571 = vmatpush.bf16.msrb.mxu1 %v980_v29 }
  0x31   : > { %296 = vrot.lane.b32.xlu0 %v295_v16, %s900_s18  ;;  %634 = vmatpush.bf16.msrb.mxu2 %v986_v31 }
  0x32   : > { %696 = vmatpush.bf16.msrb.mxu3 %v986_v31  ;;  %510 = vmatpush.bf16.msrb.mxu0 %v986_v31 }
  0x33   : > { %572 = vmatpush.bf16.msrb.mxu1 %v986_v31 }
  0x34   : > { %663 = vrot.lane.b32.xlu1 %v662_v21, %s901_s19  ;;  %v814_v21 = vld [vmem:[%s937_s17 + $0x18] sm:$0xf] }
  0x35   : > { %635 = vmatpush.bf16.msrb.mxu2 %v868_v10 }
  0x36   : > { %697 = vmatpush.bf16.msrb.mxu3 %v868_v10  ;;  %511 = vmatpush.bf16.msrb.mxu0 %v868_v10 }
  0x37   : > { %606 = vrot.lane.b32.xlu2 %v605_v38, %s900_s18  ;;  %573 = vmatpush.bf16.msrb.mxu1 %v868_v10 }
  0x39   : > { %601 = vrot.lane.b32.xlu0 %v600_v35, %s901_s19  ;;  %636 = vmatpush.bf16.msrb.mxu2 %v867_v11  ;;  %v794_v35 = vld [vmem:[%s937_s17 + $0x8] sm:$0xf] }
  0x3a   : > { %698 = vmatpush.bf16.msrb.mxu3 %v867_v11  ;;  %512 = vmatpush.bf16.msrb.mxu0 %v867_v11 }
  0x3b   : > { %574 = vmatpush.bf16.msrb.mxu1 %v867_v11 }
  0x3c   : > { %618 = vrot.lane.b32.xlu1 %v617_v42, %s902_s20  ;;  %v844_v42 = vld [vmem:[%s937_s17 + $0x30] sm:$0xf] }
  0x3f   : > { %680 = vrot.lane.b32.xlu2 %v679_v56, %s902_s20  ;;  %v824_v56 = vld [vmem:[%s937_s17 + $0x20] sm:$0xf] }
  0x41   : > { %668 = vrot.lane.b32.xlu0 %v667_v54, %s900_s18 }
  0x44   : > { %539 = vrot.lane.b32.xlu1 %v538_v59, %s901_s19 }
  0x47   : > { %482 = vrot.lane.b32.xlu2 %v481_v3, %s900_s18 }
  0x49   : > { %477 = vrot.lane.b32.xlu0 %v476_v2, %s901_s19 }
  0x4c   : > { %494 = vrot.lane.b32.xlu1 %v493_v5, %s902_s20 }
  0x4f   : > { %556 = vrot.lane.b32.xlu2 %v555_v9, %s902_s20 }
  0x51   : > { %544 = vrot.lane.b32.xlu0 %v543_v8, %s900_s18 }
  0x71   : > { %v204_v12 = vpop.permute.xlu2 %203 }
  0x79   : > { %v371_v14 = vpop.permute.xlu2 %370 }
  0x81   : > { %v433_v22 = vpop.permute.xlu2 %432 }
  0x86   : > { %v359_v13 = vpop.permute.xlu1 %358 }
  0x89   : > { %v309_v29 = vpop.permute.xlu2 %308 }
  0x8b   : > { %v354_v16 = vpop.permute.xlu0 %353 }
  0x8c   : > { %v374_v17 = vsel %vm217_vm0, %v804_v15, %v354_v16 }
  0x8d   : > { %v376_v18 = vsel %vm221_vm1, %v374_v17, %v359_v13 }
  0x8e   : > { %v421_v19 = vpop.permute.xlu1 %420  ;;  %v378_v20 = vsel %vm224_vm2, %v376_v18, %v371_v14 }
  0x8f   : > { %812 = vmatmul.msk.bf16.vlgmr.msra.gmra.mxu2 %vm254_vm3, %v378_v20 }
  0x91   : > { %v607_v39 = vpop.permute.xlu2 %606 }
  0x93   : > { %v416_v23 = vpop.permute.xlu0 %415 }
  0x94   : > { %v436_v24 = vsel %vm217_vm0, %v814_v21, %v416_v23 }
  0x95   : > { %v438_v25 = vsel %vm221_vm1, %v436_v24, %v421_v19 }
  0x96   : > { %v292_v26 = vpop.permute.xlu1 %291  ;;  %v440_v27 = vsel %vm224_vm2, %v438_v25, %v433_v22 }
  0x97   : > { %822 = vmatmul.msk.bf16.vlgmr.msra.gmra.mxu3 %vm254_vm3, %v440_v27  ;;  %v312_v36 = vsel %vm217_vm0, %v794_v35, %v292_v26 }
  0x99   : > { %v681_v47 = vpop.permute.xlu2 %680 }
  0x9b   : > { %v199_v30 = vpop.permute.xlu0 %198 }
  0x9c   : > { %v220_v31 = vsel %vm217_vm0, %v181_v28, %v199_v30 }
  0x9d   : > { %v223_v33 = vsel %vm221_vm1, %v220_v31, %v204_v12 }
  0x9e   : > { %v216_v32 = vpop.permute.xlu1 %215 }
  0x9f   : > { %v226_v34 = vsel %vm224_vm2, %v223_v33, %v216_v32 }
  0xa0   : > { %793 = vmatmul.msk.bf16.vlgmr.msra.gmra.mxu0 %vm254_vm3, %v226_v34 }
  0xa1   : > { %v483_v55 = vpop.permute.xlu2 %482 }
  0xa3   : > { %v297_v37 = vpop.permute.xlu0 %296 }
  0xa4   : > { %v314_v38 = vsel %vm221_vm1, %v312_v36, %v297_v37 }
  0xa5   : > { %v316_v40 = vsel %vm224_vm2, %v314_v38, %v309_v29 }
  0xa6   : > { %802 = vmatmul.msk.bf16.vlgmr.msra.gmra.mxu1 %vm254_vm3, %v316_v40  ;;  %v664_v41 = vpop.permute.xlu1 %663 }
  0xa7   : > { %v684_v50 = vsel %vm217_vm0, %v854_v49, %v664_v41 }
  0xa9   : > { %v557_v63 = vpop.permute.xlu2 %556 }
  0xab   : > { %v602_v43 = vpop.permute.xlu0 %601 }
  0xac   : > { %v622_v44 = vsel %vm217_vm0, %v844_v42, %v602_v43 }
  0xad   : > { %v624_v45 = vsel %vm221_vm1, %v622_v44, %v607_v39 }
  0xae   : > { %v619_v46 = vpop.permute.xlu1 %618 }
  0xaf   : > { %v626_v48 = vsel %vm224_vm2, %v624_v45, %v619_v46 }
  0xb0   : > { %852 = vmatmul.msk.bf16.vlgmr.msrb.gmra.mxu2 %vm254_vm3, %v626_v48 }
  0xb3   : > { %v669_v51 = vpop.permute.xlu0 %668 }
  0xb4   : > { %v686_v52 = vsel %vm221_vm1, %v684_v50, %v669_v51 }
  0xb5   : > { %v688_v53 = vsel %vm224_vm2, %v686_v52, %v681_v47 }
  0xb6   : > { %862 = vmatmul.msk.bf16.vlgmr.msrb.gmra.mxu3 %vm254_vm3, %v688_v53  ;;  %v540_v54 = vpop.permute.xlu1 %539 }
  0xb7   : > { %v560_v0 = vsel %vm217_vm0, %v834_v62, %v540_v54 }
  0xbb   : > { %v478_v57 = vpop.permute.xlu0 %477 }
  0xbc   : > { %v498_v58 = vsel %vm217_vm0, %v824_v56, %v478_v57 }
  0xbd   : > { %v500_v59 = vsel %vm221_vm1, %v498_v58, %v483_v55 }
  0xbe   : > { %v495_v60 = vpop.permute.xlu1 %494 }
  0xbf   : > { %v502_v61 = vsel %vm224_vm2, %v500_v59, %v495_v60 }
  0xc0   : > { %832 = vmatmul.msk.bf16.vlgmr.msrb.gmra.mxu0 %vm254_vm3, %v502_v61 }
  0xc3   : > { %v545_v1 = vpop.permute.xlu0 %544 }
  0xc4   : > { %v562_v2 = vsel %vm221_vm1, %v560_v0, %v545_v1 }
  0xc5   : > { %v564_v3 = vsel %vm224_vm2, %v562_v2, %v557_v63 }
  0xc6   : > { %842 = vmatmul.msk.bf16.vlgmr.msrb.gmra.mxu1 %vm254_vm3, %v564_v3 }
 0x112   : > { %v390_v5 = vpop.f32.mrf.mxu2 }
 0x113   : > { %v391_v6 = vadd.f32 %v891_v4, %v390_v5 }
 0x115   : > { %v394_v7 = vmax.f32 %v391_v6, 0.0 }
 0x117   : > { %v395_v8 = vpack.c.bf16 %v394_v7, %v394_v7 }
 0x119   : > { %813 = vst.msk [vmem:[%s1074_s7 + $0x8] sm:$0xf] %vm272_vm4, %v395_v8 }
 0x11a   : > { %v392_v9 = vpop.f32.mrf.mxu2  ;;  %v452_v10 = vpop.f32.mrf.mxu3 }
 0x11b   : > { %v453_v11 = vadd.f32 %v891_v4, %v452_v10 }
 0x11d   : > { %v456_v12 = vmax.f32 %v453_v11, 0.0  ;;  %v266_v13 = vpop.f32.mrf.mxu0 }
 0x11e   : > { %v267_v14 = vadd.f32 %v891_v4, %v266_v13 }
 0x11f   : > { %v457_v15 = vpack.c.bf16 %v456_v12, %v456_v12 }
 0x120   : > { %v270_v16 = vmax.f32 %v267_v14, 0.0 }
 0x121   : > { %823 = vst.msk [vmem:[%s1074_s7 + $0xc] sm:$0xf] %vm272_vm4, %v457_v15 }
 0x122   : > { %v271_v17 = vpack.c.bf16 %v270_v16, %v270_v16  ;;  %v454_v18 = vpop.f32.mrf.mxu3 }
 0x123   : > { %v328_v19 = vpop.f32.mrf.mxu1 }
 0x124   : > { %273 = vst.msk [vmem:[%s1074_s7] sm:$0xf] %vm272_vm4, %v271_v17  ;;  %v329_v20 = vadd.f32 %v891_v4, %v328_v19 }
 0x125   : > { %v268_v21 = vpop.f32.mrf.mxu0 }
 0x126   : > { %v332_v22 = vmax.f32 %v329_v20, 0.0 }
 0x128   : > { %v333_v23 = vpack.c.bf16 %v332_v22, %v332_v22 }
 0x12a   : > { %803 = vst.msk [vmem:[%s1074_s7 + $0x4] sm:$0xf] %vm272_vm4, %v333_v23 }
 0x12b   : > { %v330_v24 = vpop.f32.mrf.mxu1 }
 0x133   : > { %v638_v25 = vpop.f32.mrf.mxu2 }
 0x134   : > { %v639_v26 = vadd.f32 %v891_v4, %v638_v25 }
 0x136   : > { %v642_v27 = vmax.f32 %v639_v26, 0.0 }
 0x138   : > { %v643_v28 = vpack.c.bf16 %v642_v27, %v642_v27 }
 0x139   : > { %v700_v29 = vpop.f32.mrf.mxu3 }
 0x13a   : > { %853 = vst.msk [vmem:[%s1074_s7 + $0x18] sm:$0xf] %vm272_vm4, %v643_v28  ;;  %v701_v30 = vadd.f32 %v891_v4, %v700_v29 }
 0x13b   : > { %v640_v31 = vpop.f32.mrf.mxu2 }
 0x13c   : > { %v704_v32 = vmax.f32 %v701_v30, 0.0 }
 0x13d   : > { %v514_v33 = vpop.f32.mrf.mxu0 }
 0x13e   : > { %v705_v34 = vpack.c.bf16 %v704_v32, %v704_v32  ;;  %v515_v35 = vadd.f32 %v891_v4, %v514_v33 }
 0x140   : > { %863 = vst.msk [vmem:[%s1074_s7 + $0x1c] sm:$0xf] %vm272_vm4, %v705_v34  ;;  %v518_v36 = vmax.f32 %v515_v35, 0.0 }
 0x141   : > { %v702_v37 = vpop.f32.mrf.mxu3 }
 0x142   : > { %v519_v38 = vpack.c.bf16 %v518_v36, %v518_v36 }
 0x143   : > { %v576_v39 = vpop.f32.mrf.mxu1 }
 0x144   : > { %833 = vst.msk [vmem:[%s1074_s7 + $0x10] sm:$0xf] %vm272_vm4, %v519_v38  ;;  %v577_v40 = vadd.f32 %v891_v4, %v576_v39 }
 0x145   : > { %v516_v41 = vpop.f32.mrf.mxu0 }
 0x146   : > { %v580_v42 = vmax.f32 %v577_v40, 0.0 }
 0x148   : > { %v581_v43 = vpack.c.bf16 %v580_v42, %v580_v42 }
 0x14a   : > { %843 = vst.msk [vmem:[%s1074_s7 + $0x14] sm:$0xf] %vm272_vm4, %v581_v43 }
 0x14b   : > { %v578_v44 = vpop.f32.mrf.mxu1 }
 0x14c PF: > { %s13_s12 = sadd.s32 1, %s898_s12  }
 0x14d   : > { %p10_p4 = scmp.ge.s32.totalorder %s13_s12, 4  }
 0x14f   :  { %12 = sbr.rel (!%p10_p4) target bundleno = 1 (0x1), region = 77 }

// kernel: gesture_backbone_forward.3
= control target key start
LH: loop header
LB: loop body
LE: loop exit
PB: predicated region body
PF: predicated region fallthrough
CT: control target
= control target key end

     0   :  { %10 = vsyncpa [#allocation3], 0  ;;  %s977_s0 = inlined_call_operand.vmem [shape: bf16[2,5,5,32], index: 0, kind: input, shape index: {}]   ;;  %s978_s1 = inlined_call_operand.vmem [shape: bf16[128,16], index: 1, kind: input, shape index: {}]   ;;  %s979_s2 = inlined_call_operand.vmem [shape: f32[1,16], index: 2, kind: input, shape index: {}]   ;;  %s980_s3 = inlined_call_operand.vmem [shape: bf16[16,32], index: 3, kind: input, shape index: {}]   ;;  %s981_s4 = inlined_call_operand.vmem [shape: f32[1,32], index: 4, kind: input, shape index: {}]   ;;  %s982_s5 = inlined_call_operand.hbm [shape: f32[2,1,32], index: 5, kind: output, shape index: {}]  }
   0x1   :  { %12 = vsyncpa [#allocation3 + $0x1], 0  ;;  %s815_s18 = smov 0   ;;  %s817_s19 = smov 0  }
   0x2   :  { %s819_s20 = smov 0   ;;  %s821_s21 = smov 0  }
   0x3 LB: > { %s836_s22 = sadd.s32 4294967295, %s780_s21   ;;  %s613_s23 = sadd.s32 4294967294, %s780_s21   ;;  %s780_s21 = sphi %s821_s21, %s988_s21   ;;  %s776_s20 = sphi %s819_s20, %s987_s20   ;;  %s772_s19 = sphi %s817_s19, %s986_s19   ;;  %s768_s18 = sphi %s815_s18, %s985_s18  }
   0x4   : > { %s840_s24 = sadd.s32 1, %s780_s21   ;;  %s135_s25 = sadd.s32 1, %s776_s20 }
   0x5   : > { %s132_s26 = ssub.s32 %s780_s21, %s840_s24  ;;  %p145_p0 = scmp.ne.s32.totalorder %s776_s20, %s772_s19 }
   0x6   : > { %p133_p1 = scmp.eq.s32.totalorder %s132_s26, 0  ;;  %p146_p2 = scmp.eq.s32.totalorder %s836_s22, 1 }
   0x7   : > { %p151_p3 = scmp.ne.s32.totalorder %s772_s19, %s768_s18  ;;  %p152_p4 = scmp.eq.s32.totalorder %s613_s23, 1 }
   0x8   : > { %s851_s27 = scalar_select %p133_p1, %s776_s20, %s135_s25  }
   0x9   : > { %p853_p5 = por %p146_p2, %p145_p0  ;;  %p857_p6 = por %p152_p4, %p151_p3 }
   0xa   : > { %p616_p7 = scmp.ge.s32.totalorder %s780_s21, 1  ;;  %p190_p8 = scmp.lt.s32.totalorder %s780_s21, 3 }
   0xc   : > { %p191_p9 = pnand %p616_p7, %p190_p8 }
   0xd   : > { %p217_p10 = scmp.lt.s32.totalorder (!%p191_p9), %s836_s22, 1  ;;  %s782_s12 = smov (!%p191_p9), 64  }
   0xe   : > { %194 = sbr.rel (%p191_p9) target bundleno = 463 (0x1cf), region = 40  ;;  %s783_s17 = smov (!%p191_p9), 96  }
   0xf   : > { %s784_s23 = smov (!%p191_p9), 32   ;;  %s554_s26 = scalar_lea.hbm (!%p191_p9), %s982_s5, %s836_s22 }
  0x10   : > { %s558_s10 = sshll.u32 (!%p191_p9), %s554_s26, 4  ;;  %s559_s10 = int_to_ptr.hbm [resolvable:$true] %s558_s10 }
  0x13   : > { %s218_s30 = scalar_select %p217_p10, %s836_s22, 1  ;;  %v672_v14 = vld [vmem:[%s978_s1 + $0x38] sm:$0xff]  ;;  %v671_v23 = vld [vmem:[%s978_s1 + $0x30] sm:$0xff]  ;;  %v670_v32 = vld [vmem:[%s978_s1 + $0x28] sm:$0xff]  ;;  %vm274_vm0 = vcmask 261120   ;;  %vm278_vm1 = vcmask 523264  }
  0x14   : > { %441 = vmatpush.bf16.msra.mxu2 %v672_v14  ;;  %493 = vmatpush.bf16.msra.mxu3 %v672_v14  ;;  %v669_v39 = vld [vmem:[%s978_s1 + $0x20] sm:$0xff]  ;;  %v668_v44 = vld [vmem:[%s978_s1 + $0x18] sm:$0xff]  ;;  %v667_v52 = vld [vmem:[%s978_s1 + $0x10] sm:$0xff]  ;;  %vm281_vm2 = vcmask 785408   ;;  %vm350_vm3 = vcmask 125952   ;;  %vm526_vm4 = vcmask 130048  }
  0x15   : > { %s674_s6 = smul.u32 20, %s218_s30  ;;  %389 = vmatpush.bf16.msra.mxu1 %v672_v14  ;;  %336 = vmatpush.bf16.msra.mxu0 %v672_v14  ;;  %v666_v53 = vld [vmem:[%s978_s1 + $0x8] sm:$0xff]  ;;  %v665_v54 = vld [vmem:[%s978_s1] sm:$0xff]  ;;  %vm543_vm5 = vcmask 253952  }
  0x17   : > { %s868_s9 = scalar_lea.vmem %s977_s0, %s674_s6 }
  0x18   : > { %v871_v0 = vld [vmem:[%s868_s9 + $0xc] sm:$0x3]  ;;  %v653_v2 = vld [vmem:[%s868_s9 + $0x8] sm:$0x7]  ;;  %v619_v6 = vld [vmem:[%s868_s9 + $0x4] sm:$0x7]  ;;  %442 = vmatpush.bf16.msra.mxu2 %v671_v23  ;;  %494 = vmatpush.bf16.msra.mxu3 %v671_v23 }
  0x19   : > { %v655_v1 = vld [vmem:[%s868_s9 + $0xc] sm:$0x7]  ;;  %v417_v3 = vunpack.c.l.b16 %v871_v0  ;;  %v370_v5 = vunpack.c.l.b16 %v653_v2  ;;  %v656_v7 = vld [vmem:[%s868_s9 + $0x10] sm:$0x3]  ;;  %v263_v8 = vunpack.c.l.b16 %v619_v6  ;;  %v879_v13 = vld [vmem:[%s868_s9 + $0x4] sm:$0x3]  ;;  %390 = vmatpush.bf16.msra.mxu1 %v671_v23  ;;  %337 = vmatpush.bf16.msra.mxu0 %v671_v23 }
  0x1a   : > { %v422_v4 = vunpack.c.l.b16 %v655_v1  ;;  %v469_v9 = vunpack.c.l.b16 %v656_v7  ;;  %v657_v17 = vld [vmem:[%s868_s9 + $0x10] sm:$0x7]  ;;  %v241_v18 = vld [vmem:[%s868_s9] sm:$0x7]  ;;  %v258_v24 = vunpack.c.l.b16 %v879_v13  ;;  %v652_v45 = vld [vmem:[%s868_s9 + $0x8] sm:$0x3] }
  0x1b   : > { %v418_v10 = vpack.c.b16 %v417_v3, %v417_v3  ;;  %v371_v12 = vpack.c.b16 %v370_v5, %v370_v5  ;;  %v264_v15 = vpack.c.b16 %v263_v8, %v263_v8  ;;  %v474_v27 = vunpack.c.l.b16 %v657_v17  ;;  %v240_v8 = vld [vmem:[%s868_s9] sm:$0x3]  ;;  %s738_s9 = scalar_lea.hbm %s982_s5, 2 }
  0x1c   : > { %v423_v11 = vpack.c.b16 %v422_v4, %v422_v4  ;;  %v470_v16 = vpack.c.b16 %v469_v9, %v469_v9  ;;  %v246_v28 = vunpack.c.l.b16 %v241_v18  ;;  %v259_v33 = vpack.c.b16 %v258_v24, %v258_v24  ;;  %443 = vmatpush.bf16.msra.mxu2 %v670_v32  ;;  %495 = vmatpush.bf16.msra.mxu3 %v670_v32  ;;  %v717_v17 = vld [vmem:[%s979_s2] ss:$0 sm:$0xff] }
  0x1d   : > { %419 = vrot.lane.b32.xlu0 %v418_v10, %s782_s12  ;;  %v373_v21 = vshrl.u32 %v371_v12, 16  ;;  %v375_v22 = vshll.u32 %v371_v12, 16  ;;  %v268_v31 = vshll.u32 %v264_v15, 16  ;;  %v475_v35 = vpack.c.b16 %v474_v27, %v474_v27  ;;  %391 = vmatpush.bf16.msra.mxu1 %v670_v32  ;;  %v673_v18 = vld [vmem:[%s980_s3] sm:$0xff] }
  0x1e   : > { %v425_v19 = vshrl.u32 %v423_v11, 16  ;;  %v427_v20 = vshll.u32 %v423_v11, 16  ;;  %471 = vrot.lane.b32.xlu2 %v470_v16, %s782_s12  ;;  %v247_v34 = vpack.c.b16 %v246_v28, %v246_v28  ;;  %v266_v37 = vshrl.u32 %v264_v15, 16  ;;  %338 = vmatpush.bf16.msra.mxu0 %v670_v32 }
  0x1f   : > { %v377_v26 = vrot.slane %v375_v22, 1  ;;  %v270_v38 = vrot.slane %v268_v31, 1  ;;  %v479_v42 = vshll.u32 %v475_v35, 16  ;;  %v477_v47 = vshrl.u32 %v475_v35, 16 }
  0x20   : > { %v429_v25 = vrot.slane %v427_v20, 1  ;;  %v251_v36 = vshll.u32 %v247_v34, 16  ;;  %v249_v40 = vshrl.u32 %v247_v34, 16  ;;  %444 = vmatpush.bf16.msra.mxu2 %v669_v39  ;;  %496 = vmatpush.bf16.msra.mxu3 %v669_v39  ;;  %v365_v49 = vunpack.c.l.b16 %v652_v45 }
  0x21   : > { %v378_v30 = vor.u32 %v377_v26, %v373_v21  ;;  %v271_v43 = vor.u32 %v270_v38, %v266_v37  ;;  %v481_v48 = vrot.slane %v479_v42, 1  ;;  %392 = vmatpush.bf16.msra.mxu1 %v669_v39 }
  0x22   : > { %v430_v29 = vor.u32 %v429_v25, %v425_v19  ;;  %v253_v41 = vrot.slane %v251_v36, 1  ;;  %339 = vmatpush.bf16.msra.mxu0 %v669_v39  ;;  %v366_v51 = vpack.c.b16 %v365_v49, %v365_v49 }
  0x23   : > { %v482_v50 = vor.u32 %v481_v48, %v477_v47 }
  0x24   : > { %431 = vrot.lane.b32.xlu1 %v430_v29, %s783_s17  ;;  %v254_v46 = vor.u32 %v253_v41, %v249_v40  ;;  %445 = vmatpush.bf16.msra.mxu2 %v668_v44 }
  0x25   : > { %414 = vrot.lane.b32.xlu0 %v378_v30, %s784_s23  ;;  %497 = vmatpush.bf16.msra.mxu3 %v668_v44 }
  0x26   : > { %260 = vrot.lane.b32.xlu2 %v259_v33, %s782_s12  ;;  %393 = vmatpush.bf16.msra.mxu1 %v668_v44 }
  0x27   : > { %340 = vmatpush.bf16.msra.mxu0 %v668_v44 }
  0x28   : > { %446 = vmatpush.bf16.msra.mxu2 %v667_v52 }
  0x29   : > { %498 = vmatpush.bf16.msra.mxu3 %v667_v52 }
  0x2a   : > { %394 = vmatpush.bf16.msra.mxu1 %v667_v52 }
  0x2b   : > { %341 = vmatpush.bf16.msra.mxu0 %v667_v52 }
  0x2c   : > { %466 = vrot.lane.b32.xlu1 %v430_v29, %s784_s23  ;;  %447 = vmatpush.bf16.msra.mxu2 %v666_v53 }
  0x2d   : > { %362 = vrot.lane.b32.xlu0 %v271_v43, %s784_s23  ;;  %499 = vmatpush.bf16.msra.mxu3 %v666_v53 }
  0x2e   : > { %255 = vrot.lane.b32.xlu2 %v254_v46, %s784_s23  ;;  %395 = vmatpush.bf16.msra.mxu1 %v666_v53 }
  0x2f   : > { %342 = vmatpush.bf16.msra.mxu0 %v666_v53 }
  0x30   : > { %448 = vmatpush.bf16.msra.mxu2 %v665_v54 }
  0x31   : > { %500 = vmatpush.bf16.msra.mxu3 %v665_v54 }
  0x32   : > { %396 = vmatpush.bf16.msra.mxu1 %v665_v54 }
  0x33   : > { %343 = vmatpush.bf16.msra.mxu0 %v665_v54 }
  0x34   : > { %483 = vrot.lane.b32.xlu1 %v482_v50, %s783_s17 }
  0x35   : > { %367 = vrot.lane.b32.xlu0 %v366_v51, %s782_s12  ;;  %s732_s12 = sshra.s32 %s559_s10, 4  ;;  %s733_s12 = int_to_ptr.hbm [resolvable:$true] %s732_s12 }
  0x36   : > { %379 = vrot.lane.b32.xlu2 %v378_v30, %s783_s17  ;;  %s734_s13 = scalar_lea.hbm %s733_s12, 1  ;;  %p739_p0 = scmp.lt.s32.totalorder %s733_s12, %s982_s5 }
  0x37   : > { %537 = vmatpush.bf16.msrb.mxu0 %v673_v18  ;;  %p735_p11 = scmp.ne.s32.totalorder %s733_s12, %s734_s13  ;;  %p740_p1 = scmp.lt.s32.totalorder %s738_s9, %s734_s13 }
  0x39   : > { %p736_p12 = pnand %p735_p11, %p853_p5  ;;  %p741_p2 = por %p740_p1, %p739_p0 }
  0x3b   : > { %p737_p13 = pneg %p736_p12 }
  0x3c   : > { %272 = vrot.lane.b32.xlu1 %v271_v43, %s783_s17  ;;  %s215_s17 = sand.u32 1, %s772_s19  }
  0x3d   : > { %s216_s7 = scalar_lea.vmem [#allocation2], %s215_s17  ;;  %s546_s11 = scalar_lea.sflag [#allocation3], %s215_s17 }
  0x3e   : > { %s556_s8 = sshll.u32 %s216_s7, 4  ;;  %p742_p3 = pnand %p741_p2, %p737_p13  ;;  %s557_s8 = int_to_ptr.vmem [resolvable:$true] %s556_s8 }
  0x78   : > { %v472_v55 = vpop.permute.xlu2 %471 }
  0x80   : > { %v261_v57 = vpop.permute.xlu2 %260 }
  0x88   : > { %v256_v1 = vpop.permute.xlu2 %255 }
  0x89   : > { %v277_v14 = vsel %vm274_vm0, %v240_v8, %v256_v1 }
  0x8a   : > { %v280_v15 = vsel %vm278_vm1, %v277_v14, %v261_v57 }
  0x8f   : > { %v420_v56 = vpop.permute.xlu0 %419 }
  0x90   : > { %v380_v7 = vpop.permute.xlu2 %379 }
  0x96   : > { %v432_v58 = vpop.permute.xlu1 %431 }
  0x97   : > { %v415_v59 = vpop.permute.xlu0 %414 }
  0x98   : > { %v435_v60 = vsel %vm274_vm0, %v652_v45, %v415_v59 }
  0x99   : > { %v437_v61 = vsel %vm278_vm1, %v435_v60, %v420_v56 }
  0x9a   : > { %v439_v62 = vsel %vm281_vm2, %v437_v61, %v432_v58 }
  0x9b   : > { %449 = vmatmul.bf16.vlgmr.msra.gmra.mxu2 %v439_v62 }
  0x9e   : > { %v467_v63 = vpop.permute.xlu1 %466 }
  0x9f   : > { %v363_v2 = vpop.permute.xlu0 %362  ;;  %v487_v3 = vsel %vm274_vm0, %v871_v0, %v467_v63 }
  0xa0   : > { %v489_v5 = vsel %vm278_vm1, %v487_v3, %v472_v55  ;;  %v383_v9 = vsel %vm274_vm0, %v879_v13, %v363_v2 }
  0xa6   : > { %v484_v4 = vpop.permute.xlu1 %483 }
  0xa7   : > { %v491_v6 = vsel %vm281_vm2, %v489_v5, %v484_v4  ;;  %v368_v10 = vpop.permute.xlu0 %367  ;;  %v519_v4 = vld [vmem:[%s981_s4] sm:$0x1] }
  0xa8   : > { %501 = vmatmul.bf16.vlgmr.msra.gmra.mxu3 %v491_v6  ;;  %v385_v11 = vsel %vm278_vm1, %v383_v9, %v368_v10 }
  0xa9   : > { %v387_v12 = vsel %vm281_vm2, %v385_v11, %v380_v7 }
  0xaa   : > { %397 = vmatmul.bf16.vlgmr.msra.gmra.mxu1 %v387_v12 }
  0xae   : > { %v273_v0 = vpop.permute.xlu1 %272 }
  0xaf   : > { %v283_v16 = vsel %vm281_vm2, %v280_v15, %v273_v0 }
  0xb0   : > { %344 = vmatmul.bf16.vlgmr.msra.gmra.mxu0 %v283_v16 }
 0x11e   : > { %v450_v13 = vpop.f32.mrf.mxu2 }
 0x11f   : > { %v451_v19 = vadd.f32 %v717_v17, %v450_v13 }
 0x121   : > { %v454_v20 = vmax.f32 %v451_v19, 0.0 }
 0x123   : > { %v455_v22 = vsel %vm350_vm3, %v454_v20, 0.0 }
 0x124   : > { %v456_v25 = vrot.slane %v455_v22, 4 }
 0x126   : > { %v452_v21 = vpop.f32.mrf.mxu2  ;;  %v457_v34 = vadd.f32 %v456_v25, %v455_v22 }
 0x127   : > { %v398_v23 = vpop.f32.mrf.mxu1 }
 0x128   : > { %v399_v24 = vadd.f32 %v717_v17, %v398_v23  ;;  %v458_v42 = vrot.slane %v457_v34, 2 }
 0x12a   : > { %v402_v26 = vmax.f32 %v399_v24, 0.0  ;;  %v459_v50 = vadd.f32 %v458_v42, %v457_v34 }
 0x12b   : > { %v502_v27 = vpop.f32.mrf.mxu3 }
 0x12c   : > { %v503_v28 = vadd.f32 %v717_v17, %v502_v27  ;;  %v403_v29 = vsel %vm350_vm3, %v402_v26, 0.0  ;;  %v460_v55 = vrot.slane %v459_v50, 1 }
 0x12d   : > { %v345_v30 = vpop.f32.mrf.mxu0  ;;  %v404_v31 = vrot.slane %v403_v29, 4 }
 0x12e   : > { %v506_v32 = vmax.f32 %v503_v28, 0.0  ;;  %v346_v33 = vadd.f32 %v717_v17, %v345_v30  ;;  %v461_v60 = vadd.f32 %v460_v55, %v459_v50 }
 0x12f   : > { %v405_v35 = vadd.f32 %v404_v31, %v403_v29  ;;  %v400_v38 = vpop.f32.mrf.mxu1 }
 0x130   : > { %v507_v36 = vsel %vm350_vm3, %v506_v32, 0.0  ;;  %v349_v37 = vmax.f32 %v346_v33, 0.0 }
 0x131   : > { %v508_v39 = vrot.slane %v507_v36, 4  ;;  %v406_v40 = vrot.slane %v405_v35, 2 }
 0x132   : > { %v351_v41 = vsel %vm350_vm3, %v349_v37, 0.0 }
 0x133   : > { %v509_v43 = vadd.f32 %v508_v39, %v507_v36  ;;  %v352_v44 = vrot.slane %v351_v41, 4  ;;  %v504_v45 = vpop.f32.mrf.mxu3  ;;  %v407_v46 = vadd.f32 %v406_v40, %v405_v35 }
 0x135   : > { %v510_v47 = vrot.slane %v509_v43, 2  ;;  %v353_v48 = vadd.f32 %v352_v44, %v351_v41  ;;  %v347_v49 = vpop.f32.mrf.mxu0  ;;  %v408_v52 = vrot.slane %v407_v46, 1 }
 0x137   : > { %v354_v51 = vrot.slane %v353_v48, 2  ;;  %v511_v53 = vadd.f32 %v510_v47, %v509_v43  ;;  %v409_v57 = vadd.f32 %v408_v52, %v407_v46 }
 0x139   : > { %v355_v54 = vadd.f32 %v354_v51, %v353_v48  ;;  %v512_v58 = vrot.slane %v511_v53, 1 }
 0x13b   : > { %v356_v56 = vrot.slane %v355_v54, 1  ;;  %v513_v62 = vadd.f32 %v512_v58, %v511_v53 }
 0x13d   : > { %v357_v59 = vadd.f32 %v356_v56, %v355_v54 }
 0x13f   : > { %v410_v61 = vadd.f32 %v409_v57, %v357_v59 }
 0x141   : > { %v462_v63 = vadd.f32 %v461_v60, %v410_v61 }
 0x143   : > { %v514_v1 = vadd.f32 %v513_v62, %v462_v63 }
 0x145   : > { %v515_v2 = vmul.f32 0.0625, %v514_v1 }
 0x147   : > { %v516_v3 = vpack.c.bf16 %v515_v2, %v515_v2 }
 0x149   : > { %662 = vmatmul.msk.bf16.vlgmr.msrb.gmra.mxu0 %vm526_vm4, %v516_v3 }
 0x1c6   : > { %v539_v5 = vpop.f32.mrf.mxu0 }
 0x1c7   : > { %v540_v6 = vadd.f32 %v539_v5, %v519_v4 }
 0x1c9   : > { %544 = vst.msk [vmem:[%s216_s7] sm:$0x1] %vm543_vm5, %v540_v6 }
 0x1ca   : > { %745 = shalt.err (!%p742_p3)
}
 0x1cb   : > { %675 = dma.vmem_to_hbm [thread:$0]  (%p853_p5), %s557_s8, 16, %s559_s10, %s546_s11  }
 0x1ce   : > { %v541_v7 = vpop.f32.mrf.mxu0 }
 0x1cf PF: > { %p681_p4 = scmp.ge.s32.totalorder %s780_s21, 2  ;;  %s570_s17 = sand.u32 1, %s768_s18  }
 0x1d0   : > { %s571_s23 = scalar_lea.sflag [#allocation3], %s570_s17 }
 0x1d1   : > { %p678_p7 = pnand %p681_p4, %p857_p6 }
 0x1d3   : > { %p679_p8 = pneg %p678_p7 }
 0x1d5   : > { %763 = dma.done.wait (%p679_p8), %s571_s23, 16  }
 0x1d6   : > { %765 = vsyncadd (%p679_p8), %s571_s23, 4294967280  ;;  %p15_p9 = scmp.ge.s32.totalorder %s840_s24, 4   ;;  %s985_s18 = smov %s772_s19 }
 0x1d7   : > { %s986_s19 = smov %s776_s20  ;;  %s987_s20 = smov %s851_s27 }
 0x1d8   : > { %s988_s21 = smov %s840_s24  ;;  %17 = sbr.rel (!%p15_p9) target bundleno = 3 (0x3), region = 79 }
 0x1dd   :  { %576 = vsyncpa [#allocation3], 1 }
 0x1de   :  { %578 = vsyncpa [#allocation3 + $0x1], 1 }

</bundles_post_ra>
